<compile_context>
chip_gen: v5e
topology: v5e:2x2
jax: 0.10.0
libtpu: 0.0.40
codegen_flags: <defaults>
</compile_context>

<pallas_src>
import functools
import math

import jax
import jax.numpy as jnp
from jax import lax
from jax.experimental import pallas as pl
from jax.experimental.pallas import tpu as pltpu

LN_EPS = 1e-5  # nn.LayerNorm default eps


def _embedding_kernel(ids_ref, table_ref, pos_ref, gamma_ref, beta_ref,
                      o_ref, gbuf, sems, *, tm, d_valid, inner_steps):
    """One grid step = one tile of `tm` flattened tokens.

    ids_ref   : (Np,)       int32 SMEM (scalar-prefetched flattened token ids)
    table_ref : (V, Dp)     f32 HBM ref (raw, no auto-DMA)
    pos_ref   : (tm, Dp)    f32 VMEM block of positional rows for this tile
    gamma_ref : (1, Dp)     f32 LayerNorm scale (zero-padded)
    beta_ref  : (1, Dp)     f32 LayerNorm bias  (zero-padded)
    o_ref     : (tm, Dp)    f32 output tile
    gbuf      : (2, tm, Dp) f32 double-buffered gather scratch
    sems      : (2,)        DMA semaphores, one per buffer slot
    """
    o = pl.program_id(0)            # "parallel" axis (megacore-shardable)
    i = pl.program_id(1)            # "arbitrary" axis (carries the DMA pipeline)
    t = o * inner_steps + i         # flat tile index
    slot = i % 2

    def issue_gather(tile_idx, slot_idx):
        base = tile_idx * tm

        def body(r, carry):
            tok = ids_ref[base + r]                 # scalar read before any wait
            pltpu.make_async_copy(table_ref.at[tok],
                                  gbuf.at[slot_idx, r],
                                  sems.at[slot_idx]).start()
            return carry

        lax.fori_loop(0, tm, body, 0, unroll=8)

    def wait_gather(slot_idx):
        def body(r, carry):
            # Wait descriptor only needs matching shapes; src index is irrelevant.
            pltpu.make_async_copy(table_ref.at[0],
                                  gbuf.at[slot_idx, r],
                                  sems.at[slot_idx]).wait()
            return carry

        lax.fori_loop(0, tm, body, 0, unroll=8)

    # Prime the pipeline at the start of every inner sweep.  Each megacore
    # shard of the outer axis starts its own sweep at i == 0, so no core ever
    # waits on DMAs issued by the other core.
    @pl.when(i == 0)
    def _():
        issue_gather(t, slot)

    # Prefetch the next tile's rows into the other slot; overlaps with this
    # tile's wait + LayerNorm + writeback.  Never prefetch across the outer
    # boundary -- the next sweep re-primes itself.
    @pl.when(i + 1 < inner_steps)
    def _():
        issue_gather(t + 1, 1 - slot)

    wait_gather(slot)

    # token embedding + sinusoidal positional rows
    x = gbuf[slot].astype(jnp.float32) + pos_ref[...]            # (tm, Dp)

    # LayerNorm over the first d_valid features.  Padded lanes of x are zero
    # (table and pos are zero-padded), so plain sums over Dp equal sums over
    # the valid lanes; E[x^2] - mean^2 avoids masking the centered term.
    inv_d = 1.0 / d_valid
    mean = jnp.sum(x, axis=-1, keepdims=True) * inv_d
    ex2 = jnp.sum(x * x, axis=-1, keepdims=True) * inv_d
    var = ex2 - mean * mean
    y = (x - mean) * lax.rsqrt(var + LN_EPS)
    o_ref[...] = (y * gamma_ref[...] + beta_ref[...]).astype(o_ref.dtype)


def make_freq_embedding(max_len, dim):
    """Same construction as FreqEmbedding.__init__ (sin on even, cos on odd)."""
    position = jnp.arange(max_len, dtype=jnp.float32)[:, None]
    div_term = jnp.exp(jnp.arange(0, dim, 2, dtype=jnp.float32)
                       * -(math.log(10000.0) / dim))
    pe = jnp.zeros((max_len, dim), jnp.float32)
    pe = pe.at[:, 0::2].set(jnp.sin(position * div_term))
    pe = pe.at[:, 1::2].set(jnp.cos(position * div_term))
    return pe                                                    # (max_len, dim)


def prepare_embedding_params(token_table, pe, gamma, beta):
    """Pad/cast parameters ONCE at init time (kept out of the forward pass)."""
    V, D = token_table.shape
    L = pe.shape[0]
    Dp = ((D + 127) // 128) * 128                  # lane-dense feature dim
    f32 = jnp.float32
    table_p = jnp.zeros((V, Dp), f32).at[:, :D].set(token_table.astype(f32))
    pe_p = jnp.zeros((L, Dp), f32).at[:, :D].set(pe.astype(f32))
    gamma_p = jnp.zeros((1, Dp), f32).at[:, :D].set(
        gamma.reshape(1, D).astype(f32))
    beta_p = jnp.zeros((1, Dp), f32).at[:, :D].set(
        beta.reshape(1, D).astype(f32))
    return {"table": table_p, "pe": pe_p, "gamma": gamma_p, "beta": beta_p,
            "dim": D}


def embedding_forward(ids, params, *, tm_max=256):
    B, S = ids.shape
    table, pe = params["table"], params["pe"]
    gamma, beta, D = params["gamma"], params["beta"], params["dim"]
    V, Dp = table.shape
    L = pe.shape[0]
    assert S <= L, "sequence longer than FreqEmbedding max_len"
    N = B * S

    # Token-tile size: largest multiple of 8 that divides S (so positional rows
    # can be streamed un-replicated), swept upward to tm_max -- bigger tiles
    # amortize per-step overhead and keep more row-DMAs in flight.
    tm = 0
    cand = 8
    while cand <= min(S, tm_max):
        if S % cand == 0:
            tm = cand
        cand += 8

    # Clamp guards OOB gathers (PyTorch would error; we remap out-of-range ids).
    ids_flat = jnp.clip(ids.reshape(-1).astype(jnp.int32), 0, V - 1)

    if tm:                                          # fast path: tm | S | N
        Np = N
        s_tiles = S // tm
        pos_arr = pe                                # (L, Dp); blocks < s_tiles used
        pos_block = (lambda t: t % s_tiles) if s_tiles > 1 else (lambda t: 0)
    else:
        # Fallback (S not a multiple of 8): replicate positional rows per token.
        tm = 8
        Np = pl.cdiv(N, tm) * tm
        pos_arr = jnp.zeros((Np, Dp), jnp.float32).at[:N].set(
            jnp.tile(pe[:S], (B, 1)))
        pos_block = lambda t: t
        ids_flat = jnp.zeros((Np,), jnp.int32).at[:N].set(ids_flat)

    total_tiles = Np // tm
    # grid = (outer "parallel", inner "arbitrary"): the inner sweep carries the
    # cross-step DMA double buffer; the outer axis is safe to shard across
    # TensorCores (v7x megacore).  Small grids keep outer = 1 (favor overlap).
    if total_tiles >= 8:
        outer = 4 if total_tiles % 4 == 0 else (2 if total_tiles % 2 == 0 else 1)
    else:
        outer = 1
    inner = total_tiles // outer

    kernel = functools.partial(_embedding_kernel, tm=tm, d_valid=D,
                               inner_steps=inner)

    out = pl.pallas_call(
        kernel,
        out_shape=jax.ShapeDtypeStruct((Np, Dp), jnp.float32),
        grid_spec=pltpu.PrefetchScalarGridSpec(
            num_scalar_prefetch=1,                            # token ids -> SMEM
            grid=(outer, inner),
            in_specs=[
                pl.BlockSpec(memory_space=pl.ANY),            # table stays in HBM
                pl.BlockSpec((tm, Dp),
                             lambda o, i, ids_r: (pos_block(o * inner + i), 0)),
                pl.BlockSpec((1, Dp), lambda o, i, ids_r: (0, 0)),   # gamma
                pl.BlockSpec((1, Dp), lambda o, i, ids_r: (0, 0)),   # beta
            ],
            out_specs=pl.BlockSpec((tm, Dp),
                                   lambda o, i, ids_r: (o * inner + i, 0)),
            scratch_shapes=[
                pltpu.VMEM((2, tm, Dp), table.dtype),  # double-buffered rows
                pltpu.SemaphoreType.DMA((2,)),         # one sem per buffer slot
            ],
        ),
        compiler_params=pltpu.CompilerParams(
            dimension_semantics=("parallel", "arbitrary")),
    )(ids_flat, table, pos_arr, gamma, beta)

    return out[:N, :D].reshape(B, S, D)


def embedding_reference(ids, token_table, pe, gamma, beta):
    emb = token_table[ids].astype(jnp.float32)              # (B, S, D)
    pos = pe[None, :ids.shape[1]].astype(jnp.float32)       # (1, S, D)
    x = emb + pos
    mean = jnp.mean(x, axis=-1, keepdims=True)
    var = jnp.mean((x - mean) ** 2, axis=-1, keepdims=True)
    return (x - mean) / jnp.sqrt(var + LN_EPS) * gamma + beta


if __name__ == "__main__":
    B, S, D = 2, 8, 32
    NUM_VOCAB, MAX_LEN = 50, 16

    key = jax.random.PRNGKey(0)
    k_ids, k_tab = jax.random.split(key)

    # Deterministic synthetic parameters (nn.Embedding ~ N(0,1); LayerNorm
    # weight=1, bias=0, matching the PyTorch defaults).
    token_table = jax.random.normal(k_tab, (NUM_VOCAB, D), dtype=jnp.float32)
    gamma = jnp.ones((D,), jnp.float32)
    beta = jnp.zeros((D,), jnp.float32)
    pe = make_freq_embedding(MAX_LEN, D)

    ids = jax.random.randint(k_ids, (B, S), 0, NUM_VOCAB, dtype=jnp.int32)

    params = prepare_embedding_params(token_table, pe, gamma, beta)  # once
    out = embedding_forward(ids, params)
    out = jax.block_until_ready(out)

    ref = embedding_reference(ids, token_table, pe, gamma, beta)
    assert out.shape == (B, S, D)
    assert jnp.allclose(out, ref, atol=1e-4, rtol=1e-4), "mismatch vs reference"

    print("KERNEL_OK")
</pallas_src>

<mosaic_0001>
module attributes {stable_mosaic.version = 11 : i64} {
  func.func @_embedding_kernel(%arg0: i32, %arg1: i32, %arg2: memref<16xi32, #tpu.memory_space<smem>>, %arg3: memref<50x128xf32, #tpu.memory_space<any>>, %arg4: memref<8x128xf32, #tpu.memory_space<vmem>>, %arg5: memref<1x128xf32, #tpu.memory_space<vmem>>, %arg6: memref<1x128xf32, #tpu.memory_space<vmem>>, %arg7: memref<8x128xf32, #tpu.memory_space<vmem>>, %arg8: memref<2x8x128xf32, #tpu.memory_space<vmem>>, %arg9: memref<2x!tpu.dma_semaphore, #tpu.memory_space<semaphore_mem>>) attributes {dimension_semantics = [#tpu.dimension_semantics<parallel>, #tpu.dimension_semantics<arbitrary>], iteration_bounds = array<i64: 1, 2>, scalar_prefetch = 1 : i64, scratch_operands = 2 : i64, tpu.core_type = #tpu.core_type<tc>, window_params = [{}, {transform_indices = @transform_1, window_bounds = array<i64: 8, 128>}, {pipeline_mode = #tpu.pipeline_mode<synchronous>, transform_indices = @transform_2, window_bounds = array<i64: 1, 128>}, {pipeline_mode = #tpu.pipeline_mode<synchronous>, transform_indices = @transform_3, window_bounds = array<i64: 1, 128>}, {transform_indices = @transform_4, window_bounds = array<i64: 8, 128>}]} {
    %c2_i32 = arith.constant 2 : i32
    %0 = arith.muli %arg0, %c2_i32 : i32
    %1 = arith.addi %0, %arg1 : i32
    %c2_i32_0 = arith.constant 2 : i32
    %c0_i32 = arith.constant 0 : i32
    %2 = arith.cmpi eq, %c2_i32_0, %c0_i32 : i32
    %c1_i32 = arith.constant 1 : i32
    %3 = arith.select %2, %c1_i32, %c2_i32_0 : i32
    %4 = arith.remsi %arg1, %3 : i32
    %c0_i32_1 = arith.constant 0 : i32
    %5 = arith.cmpi ne, %4, %c0_i32_1 : i32
    %c0_i32_2 = arith.constant 0 : i32
    %6 = arith.cmpi slt, %4, %c0_i32_2 : i32
    %c0_i32_3 = arith.constant 0 : i32
    %7 = arith.cmpi slt, %3, %c0_i32_3 : i32
    %8 = arith.xori %6, %7 : i1
    %9 = arith.andi %8, %5 : i1
    %10 = arith.addi %4, %3 : i32
    %11 = arith.select %9, %10, %4 : i32
    %c0_i32_4 = arith.constant 0 : i32
    %12 = arith.cmpi eq, %arg1, %c0_i32_4 : i32
    %13 = arith.extui %12 : i1 to i32
    %c0_i32_5 = arith.constant 0 : i32
    %14 = arith.cmpi ne, %13, %c0_i32_5 : i32
    scf.if %14 {
      %c8_i32_49 = arith.constant 8 : i32
      %97 = arith.muli %1, %c8_i32_49 : i32
      %c0_i32_50 = arith.constant 0 : i32
      %98 = arith.addi %97, %c0_i32_50 : i32
      %99 = arith.index_cast %98 : i32 to index
      %100 = memref.load %arg2[%99] : memref<16xi32, #tpu.memory_space<smem>>
      %c0_i32_51 = arith.constant 0 : i32
      %101 = tpu.memref_slice %arg3[%100, %c0_i32_51] : memref<50x128xf32, #tpu.memory_space<any>> -> memref<1x128xf32, #tpu.memory_space<any>>
      %102 = tpu.memref_squeeze %101 : memref<1x128xf32, #tpu.memory_space<any>> -> memref<128xf32, #tpu.memory_space<any>>
      %c0_i32_52 = arith.constant 0 : i32
      %103 = tpu.memref_slice %arg8[%11, %c0_i32_50, %c0_i32_52] : memref<2x8x128xf32, #tpu.memory_space<vmem>> -> memref<1x1x128xf32, #tpu.memory_space<vmem>>
      %104 = tpu.memref_squeeze %103 : memref<1x1x128xf32, #tpu.memory_space<vmem>> -> memref<128xf32, #tpu.memory_space<vmem>>
      %105 = tpu.memref_slice %arg9[%11] : memref<2x!tpu.dma_semaphore, #tpu.memory_space<semaphore_mem>> -> memref<1x!tpu.dma_semaphore, #tpu.memory_space<semaphore_mem>>
      %106 = tpu.memref_squeeze %105 : memref<1x!tpu.dma_semaphore, #tpu.memory_space<semaphore_mem>> -> memref<!tpu.dma_semaphore, #tpu.memory_space<semaphore_mem>>
      tpu.enqueue_dma source(%102 : memref<128xf32, #tpu.memory_space<any>>) target(%104 : memref<128xf32, #tpu.memory_space<vmem>>) target_semaphore(%106 : memref<!tpu.dma_semaphore, #tpu.memory_space<semaphore_mem>>)
      %c1_i32_53 = arith.constant 1 : i32
      %107 = arith.addi %97, %c1_i32_53 : i32
      %108 = arith.index_cast %107 : i32 to index
      %109 = memref.load %arg2[%108] : memref<16xi32, #tpu.memory_space<smem>>
      %c0_i32_54 = arith.constant 0 : i32
      %110 = tpu.memref_slice %arg3[%109, %c0_i32_54] : memref<50x128xf32, #tpu.memory_space<any>> -> memref<1x128xf32, #tpu.memory_space<any>>
      %111 = tpu.memref_squeeze %110 : memref<1x128xf32, #tpu.memory_space<any>> -> memref<128xf32, #tpu.memory_space<any>>
      %c0_i32_55 = arith.constant 0 : i32
      %112 = tpu.memref_slice %arg8[%11, %c1_i32_53, %c0_i32_55] : memref<2x8x128xf32, #tpu.memory_space<vmem>> -> memref<1x1x128xf32, #tpu.memory_space<vmem>>
      %113 = tpu.memref_squeeze %112 : memref<1x1x128xf32, #tpu.memory_space<vmem>> -> memref<128xf32, #tpu.memory_space<vmem>>
      %114 = tpu.memref_slice %arg9[%11] : memref<2x!tpu.dma_semaphore, #tpu.memory_space<semaphore_mem>> -> memref<1x!tpu.dma_semaphore, #tpu.memory_space<semaphore_mem>>
      %115 = tpu.memref_squeeze %114 : memref<1x!tpu.dma_semaphore, #tpu.memory_space<semaphore_mem>> -> memref<!tpu.dma_semaphore, #tpu.memory_space<semaphore_mem>>
      tpu.enqueue_dma source(%111 : memref<128xf32, #tpu.memory_space<any>>) target(%113 : memref<128xf32, #tpu.memory_space<vmem>>) target_semaphore(%115 : memref<!tpu.dma_semaphore, #tpu.memory_space<semaphore_mem>>)
      %c2_i32_56 = arith.constant 2 : i32
      %116 = arith.addi %97, %c2_i32_56 : i32
      %117 = arith.index_cast %116 : i32 to index
      %118 = memref.load %arg2[%117] : memref<16xi32, #tpu.memory_space<smem>>
      %c0_i32_57 = arith.constant 0 : i32
      %119 = tpu.memref_slice %arg3[%118, %c0_i32_57] : memref<50x128xf32, #tpu.memory_space<any>> -> memref<1x128xf32, #tpu.memory_space<any>>
      %120 = tpu.memref_squeeze %119 : memref<1x128xf32, #tpu.memory_space<any>> -> memref<128xf32, #tpu.memory_space<any>>
      %c0_i32_58 = arith.constant 0 : i32
      %121 = tpu.memref_slice %arg8[%11, %c2_i32_56, %c0_i32_58] : memref<2x8x128xf32, #tpu.memory_space<vmem>> -> memref<1x1x128xf32, #tpu.memory_space<vmem>>
      %122 = tpu.memref_squeeze %121 : memref<1x1x128xf32, #tpu.memory_space<vmem>> -> memref<128xf32, #tpu.memory_space<vmem>>
      %123 = tpu.memref_slice %arg9[%11] : memref<2x!tpu.dma_semaphore, #tpu.memory_space<semaphore_mem>> -> memref<1x!tpu.dma_semaphore, #tpu.memory_space<semaphore_mem>>
      %124 = tpu.memref_squeeze %123 : memref<1x!tpu.dma_semaphore, #tpu.memory_space<semaphore_mem>> -> memref<!tpu.dma_semaphore, #tpu.memory_space<semaphore_mem>>
      tpu.enqueue_dma source(%120 : memref<128xf32, #tpu.memory_space<any>>) target(%122 : memref<128xf32, #tpu.memory_space<vmem>>) target_semaphore(%124 : memref<!tpu.dma_semaphore, #tpu.memory_space<semaphore_mem>>)
      %c3_i32_59 = arith.constant 3 : i32
      %125 = arith.addi %97, %c3_i32_59 : i32
      %126 = arith.index_cast %125 : i32 to index
      %127 = memref.load %arg2[%126] : memref<16xi32, #tpu.memory_space<smem>>
      %c0_i32_60 = arith.constant 0 : i32
      %128 = tpu.memref_slice %arg3[%127, %c0_i32_60] : memref<50x128xf32, #tpu.memory_space<any>> -> memref<1x128xf32, #tpu.memory_space<any>>
      %129 = tpu.memref_squeeze %128 : memref<1x128xf32, #tpu.memory_space<any>> -> memref<128xf32, #tpu.memory_space<any>>
      %c0_i32_61 = arith.constant 0 : i32
      %130 = tpu.memref_slice %arg8[%11, %c3_i32_59, %c0_i32_61] : memref<2x8x128xf32, #tpu.memory_space<vmem>> -> memref<1x1x128xf32, #tpu.memory_space<vmem>>
      %131 = tpu.memref_squeeze %130 : memref<1x1x128xf32, #tpu.memory_space<vmem>> -> memref<128xf32, #tpu.memory_space<vmem>>
      %132 = tpu.memref_slice %arg9[%11] : memref<2x!tpu.dma_semaphore, #tpu.memory_space<semaphore_mem>> -> memref<1x!tpu.dma_semaphore, #tpu.memory_space<semaphore_mem>>
      %133 = tpu.memref_squeeze %132 : memref<1x!tpu.dma_semaphore, #tpu.memory_space<semaphore_mem>> -> memref<!tpu.dma_semaphore, #tpu.memory_space<semaphore_mem>>
      tpu.enqueue_dma source(%129 : memref<128xf32, #tpu.memory_space<any>>) target(%131 : memref<128xf32, #tpu.memory_space<vmem>>) target_semaphore(%133 : memref<!tpu.dma_semaphore, #tpu.memory_space<semaphore_mem>>)
      %c4_i32_62 = arith.constant 4 : i32
      %134 = arith.addi %97, %c4_i32_62 : i32
      %135 = arith.index_cast %134 : i32 to index
      %136 = memref.load %arg2[%135] : memref<16xi32, #tpu.memory_space<smem>>
      %c0_i32_63 = arith.constant 0 : i32
      %137 = tpu.memref_slice %arg3[%136, %c0_i32_63] : memref<50x128xf32, #tpu.memory_space<any>> -> memref<1x128xf32, #tpu.memory_space<any>>
      %138 = tpu.memref_squeeze %137 : memref<1x128xf32, #tpu.memory_space<any>> -> memref<128xf32, #tpu.memory_space<any>>
      %c0_i32_64 = arith.constant 0 : i32
      %139 = tpu.memref_slice %arg8[%11, %c4_i32_62, %c0_i32_64] : memref<2x8x128xf32, #tpu.memory_space<vmem>> -> memref<1x1x128xf32, #tpu.memory_space<vmem>>
      %140 = tpu.memref_squeeze %139 : memref<1x1x128xf32, #tpu.memory_space<vmem>> -> memref<128xf32, #tpu.memory_space<vmem>>
      %141 = tpu.memref_slice %arg9[%11] : memref<2x!tpu.dma_semaphore, #tpu.memory_space<semaphore_mem>> -> memref<1x!tpu.dma_semaphore, #tpu.memory_space<semaphore_mem>>
      %142 = tpu.memref_squeeze %141 : memref<1x!tpu.dma_semaphore, #tpu.memory_space<semaphore_mem>> -> memref<!tpu.dma_semaphore, #tpu.memory_space<semaphore_mem>>
      tpu.enqueue_dma source(%138 : memref<128xf32, #tpu.memory_space<any>>) target(%140 : memref<128xf32, #tpu.memory_space<vmem>>) target_semaphore(%142 : memref<!tpu.dma_semaphore, #tpu.memory_space<semaphore_mem>>)
      %c5_i32_65 = arith.constant 5 : i32
      %143 = arith.addi %97, %c5_i32_65 : i32
      %144 = arith.index_cast %143 : i32 to index
      %145 = memref.load %arg2[%144] : memref<16xi32, #tpu.memory_space<smem>>
      %c0_i32_66 = arith.constant 0 : i32
      %146 = tpu.memref_slice %arg3[%145, %c0_i32_66] : memref<50x128xf32, #tpu.memory_space<any>> -> memref<1x128xf32, #tpu.memory_space<any>>
      %147 = tpu.memref_squeeze %146 : memref<1x128xf32, #tpu.memory_space<any>> -> memref<128xf32, #tpu.memory_space<any>>
      %c0_i32_67 = arith.constant 0 : i32
      %148 = tpu.memref_slice %arg8[%11, %c5_i32_65, %c0_i32_67] : memref<2x8x128xf32, #tpu.memory_space<vmem>> -> memref<1x1x128xf32, #tpu.memory_space<vmem>>
      %149 = tpu.memref_squeeze %148 : memref<1x1x128xf32, #tpu.memory_space<vmem>> -> memref<128xf32, #tpu.memory_space<vmem>>
      %150 = tpu.memref_slice %arg9[%11] : memref<2x!tpu.dma_semaphore, #tpu.memory_space<semaphore_mem>> -> memref<1x!tpu.dma_semaphore, #tpu.memory_space<semaphore_mem>>
      %151 = tpu.memref_squeeze %150 : memref<1x!tpu.dma_semaphore, #tpu.memory_space<semaphore_mem>> -> memref<!tpu.dma_semaphore, #tpu.memory_space<semaphore_mem>>
      tpu.enqueue_dma source(%147 : memref<128xf32, #tpu.memory_space<any>>) target(%149 : memref<128xf32, #tpu.memory_space<vmem>>) target_semaphore(%151 : memref<!tpu.dma_semaphore, #tpu.memory_space<semaphore_mem>>)
      %c6_i32_68 = arith.constant 6 : i32
      %152 = arith.addi %97, %c6_i32_68 : i32
      %153 = arith.index_cast %152 : i32 to index
      %154 = memref.load %arg2[%153] : memref<16xi32, #tpu.memory_space<smem>>
      %c0_i32_69 = arith.constant 0 : i32
      %155 = tpu.memref_slice %arg3[%154, %c0_i32_69] : memref<50x128xf32, #tpu.memory_space<any>> -> memref<1x128xf32, #tpu.memory_space<any>>
      %156 = tpu.memref_squeeze %155 : memref<1x128xf32, #tpu.memory_space<any>> -> memref<128xf32, #tpu.memory_space<any>>
      %c0_i32_70 = arith.constant 0 : i32
      %157 = tpu.memref_slice %arg8[%11, %c6_i32_68, %c0_i32_70] : memref<2x8x128xf32, #tpu.memory_space<vmem>> -> memref<1x1x128xf32, #tpu.memory_space<vmem>>
      %158 = tpu.memref_squeeze %157 : memref<1x1x128xf32, #tpu.memory_space<vmem>> -> memref<128xf32, #tpu.memory_space<vmem>>
      %159 = tpu.memref_slice %arg9[%11] : memref<2x!tpu.dma_semaphore, #tpu.memory_space<semaphore_mem>> -> memref<1x!tpu.dma_semaphore, #tpu.memory_space<semaphore_mem>>
      %160 = tpu.memref_squeeze %159 : memref<1x!tpu.dma_semaphore, #tpu.memory_space<semaphore_mem>> -> memref<!tpu.dma_semaphore, #tpu.memory_space<semaphore_mem>>
      tpu.enqueue_dma source(%156 : memref<128xf32, #tpu.memory_space<any>>) target(%158 : memref<128xf32, #tpu.memory_space<vmem>>) target_semaphore(%160 : memref<!tpu.dma_semaphore, #tpu.memory_space<semaphore_mem>>)
      %c7_i32_71 = arith.constant 7 : i32
      %161 = arith.addi %97, %c7_i32_71 : i32
      %162 = arith.index_cast %161 : i32 to index
      %163 = memref.load %arg2[%162] : memref<16xi32, #tpu.memory_space<smem>>
      %c0_i32_72 = arith.constant 0 : i32
      %164 = tpu.memref_slice %arg3[%163, %c0_i32_72] : memref<50x128xf32, #tpu.memory_space<any>> -> memref<1x128xf32, #tpu.memory_space<any>>
      %165 = tpu.memref_squeeze %164 : memref<1x128xf32, #tpu.memory_space<any>> -> memref<128xf32, #tpu.memory_space<any>>
      %c0_i32_73 = arith.constant 0 : i32
      %166 = tpu.memref_slice %arg8[%11, %c7_i32_71, %c0_i32_73] : memref<2x8x128xf32, #tpu.memory_space<vmem>> -> memref<1x1x128xf32, #tpu.memory_space<vmem>>
      %167 = tpu.memref_squeeze %166 : memref<1x1x128xf32, #tpu.memory_space<vmem>> -> memref<128xf32, #tpu.memory_space<vmem>>
      %168 = tpu.memref_slice %arg9[%11] : memref<2x!tpu.dma_semaphore, #tpu.memory_space<semaphore_mem>> -> memref<1x!tpu.dma_semaphore, #tpu.memory_space<semaphore_mem>>
      %169 = tpu.memref_squeeze %168 : memref<1x!tpu.dma_semaphore, #tpu.memory_space<semaphore_mem>> -> memref<!tpu.dma_semaphore, #tpu.memory_space<semaphore_mem>>
      tpu.enqueue_dma source(%165 : memref<128xf32, #tpu.memory_space<any>>) target(%167 : memref<128xf32, #tpu.memory_space<vmem>>) target_semaphore(%169 : memref<!tpu.dma_semaphore, #tpu.memory_space<semaphore_mem>>)
      %c8_i32_74 = arith.constant 8 : i32
    } else {
    }
    %c1_i32_6 = arith.constant 1 : i32
    %15 = arith.addi %arg1, %c1_i32_6 : i32
    %c2_i32_7 = arith.constant 2 : i32
    %16 = arith.cmpi slt, %15, %c2_i32_7 : i32
    %17 = arith.extui %16 : i1 to i32
    %c0_i32_8 = arith.constant 0 : i32
    %18 = arith.cmpi ne, %17, %c0_i32_8 : i32
    scf.if %18 {
      %c1_i32_49 = arith.constant 1 : i32
      %97 = arith.addi %1, %c1_i32_49 : i32
      %c1_i32_50 = arith.constant 1 : i32
      %98 = arith.subi %c1_i32_50, %11 : i32
      %c8_i32_51 = arith.constant 8 : i32
      %99 = arith.muli %97, %c8_i32_51 : i32
      %c0_i32_52 = arith.constant 0 : i32
      %100 = arith.addi %99, %c0_i32_52 : i32
      %101 = arith.index_cast %100 : i32 to index
      %102 = memref.load %arg2[%101] : memref<16xi32, #tpu.memory_space<smem>>
      %c0_i32_53 = arith.constant 0 : i32
      %103 = tpu.memref_slice %arg3[%102, %c0_i32_53] : memref<50x128xf32, #tpu.memory_space<any>> -> memref<1x128xf32, #tpu.memory_space<any>>
      %104 = tpu.memref_squeeze %103 : memref<1x128xf32, #tpu.memory_space<any>> -> memref<128xf32, #tpu.memory_space<any>>
      %c0_i32_54 = arith.constant 0 : i32
      %105 = tpu.memref_slice %arg8[%98, %c0_i32_52, %c0_i32_54] : memref<2x8x128xf32, #tpu.memory_space<vmem>> -> memref<1x1x128xf32, #tpu.memory_space<vmem>>
      %106 = tpu.memref_squeeze %105 : memref<1x1x128xf32, #tpu.memory_space<vmem>> -> memref<128xf32, #tpu.memory_space<vmem>>
      %107 = tpu.memref_slice %arg9[%98] : memref<2x!tpu.dma_semaphore, #tpu.memory_space<semaphore_mem>> -> memref<1x!tpu.dma_semaphore, #tpu.memory_space<semaphore_mem>>
      %108 = tpu.memref_squeeze %107 : memref<1x!tpu.dma_semaphore, #tpu.memory_space<semaphore_mem>> -> memref<!tpu.dma_semaphore, #tpu.memory_space<semaphore_mem>>
      tpu.enqueue_dma source(%104 : memref<128xf32, #tpu.memory_space<any>>) target(%106 : memref<128xf32, #tpu.memory_space<vmem>>) target_semaphore(%108 : memref<!tpu.dma_semaphore, #tpu.memory_space<semaphore_mem>>)
      %c1_i32_55 = arith.constant 1 : i32
      %109 = arith.addi %99, %c1_i32_55 : i32
      %110 = arith.index_cast %109 : i32 to index
      %111 = memref.load %arg2[%110] : memref<16xi32, #tpu.memory_space<smem>>
      %c0_i32_56 = arith.constant 0 : i32
      %112 = tpu.memref_slice %arg3[%111, %c0_i32_56] : memref<50x128xf32, #tpu.memory_space<any>> -> memref<1x128xf32, #tpu.memory_space<any>>
      %113 = tpu.memref_squeeze %112 : memref<1x128xf32, #tpu.memory_space<any>> -> memref<128xf32, #tpu.memory_space<any>>
      %c0_i32_57 = arith.constant 0 : i32
      %114 = tpu.memref_slice %arg8[%98, %c1_i32_55, %c0_i32_57] : memref<2x8x128xf32, #tpu.memory_space<vmem>> -> memref<1x1x128xf32, #tpu.memory_space<vmem>>
      %115 = tpu.memref_squeeze %114 : memref<1x1x128xf32, #tpu.memory_space<vmem>> -> memref<128xf32, #tpu.memory_space<vmem>>
      %116 = tpu.memref_slice %arg9[%98] : memref<2x!tpu.dma_semaphore, #tpu.memory_space<semaphore_mem>> -> memref<1x!tpu.dma_semaphore, #tpu.memory_space<semaphore_mem>>
      %117 = tpu.memref_squeeze %116 : memref<1x!tpu.dma_semaphore, #tpu.memory_space<semaphore_mem>> -> memref<!tpu.dma_semaphore, #tpu.memory_space<semaphore_mem>>
      tpu.enqueue_dma source(%113 : memref<128xf32, #tpu.memory_space<any>>) target(%115 : memref<128xf32, #tpu.memory_space<vmem>>) target_semaphore(%117 : memref<!tpu.dma_semaphore, #tpu.memory_space<semaphore_mem>>)
      %c2_i32_58 = arith.constant 2 : i32
      %118 = arith.addi %99, %c2_i32_58 : i32
      %119 = arith.index_cast %118 : i32 to index
      %120 = memref.load %arg2[%119] : memref<16xi32, #tpu.memory_space<smem>>
      %c0_i32_59 = arith.constant 0 : i32
      %121 = tpu.memref_slice %arg3[%120, %c0_i32_59] : memref<50x128xf32, #tpu.memory_space<any>> -> memref<1x128xf32, #tpu.memory_space<any>>
      %122 = tpu.memref_squeeze %121 : memref<1x128xf32, #tpu.memory_space<any>> -> memref<128xf32, #tpu.memory_space<any>>
      %c0_i32_60 = arith.constant 0 : i32
      %123 = tpu.memref_slice %arg8[%98, %c2_i32_58, %c0_i32_60] : memref<2x8x128xf32, #tpu.memory_space<vmem>> -> memref<1x1x128xf32, #tpu.memory_space<vmem>>
      %124 = tpu.memref_squeeze %123 : memref<1x1x128xf32, #tpu.memory_space<vmem>> -> memref<128xf32, #tpu.memory_space<vmem>>
      %125 = tpu.memref_slice %arg9[%98] : memref<2x!tpu.dma_semaphore, #tpu.memory_space<semaphore_mem>> -> memref<1x!tpu.dma_semaphore, #tpu.memory_space<semaphore_mem>>
      %126 = tpu.memref_squeeze %125 : memref<1x!tpu.dma_semaphore, #tpu.memory_space<semaphore_mem>> -> memref<!tpu.dma_semaphore, #tpu.memory_space<semaphore_mem>>
      tpu.enqueue_dma source(%122 : memref<128xf32, #tpu.memory_space<any>>) target(%124 : memref<128xf32, #tpu.memory_space<vmem>>) target_semaphore(%126 : memref<!tpu.dma_semaphore, #tpu.memory_space<semaphore_mem>>)
      %c3_i32_61 = arith.constant 3 : i32
      %127 = arith.addi %99, %c3_i32_61 : i32
      %128 = arith.index_cast %127 : i32 to index
      %129 = memref.load %arg2[%128] : memref<16xi32, #tpu.memory_space<smem>>
      %c0_i32_62 = arith.constant 0 : i32
      %130 = tpu.memref_slice %arg3[%129, %c0_i32_62] : memref<50x128xf32, #tpu.memory_space<any>> -> memref<1x128xf32, #tpu.memory_space<any>>
      %131 = tpu.memref_squeeze %130 : memref<1x128xf32, #tpu.memory_space<any>> -> memref<128xf32, #tpu.memory_space<any>>
      %c0_i32_63 = arith.constant 0 : i32
      %132 = tpu.memref_slice %arg8[%98, %c3_i32_61, %c0_i32_63] : memref<2x8x128xf32, #tpu.memory_space<vmem>> -> memref<1x1x128xf32, #tpu.memory_space<vmem>>
      %133 = tpu.memref_squeeze %132 : memref<1x1x128xf32, #tpu.memory_space<vmem>> -> memref<128xf32, #tpu.memory_space<vmem>>
      %134 = tpu.memref_slice %arg9[%98] : memref<2x!tpu.dma_semaphore, #tpu.memory_space<semaphore_mem>> -> memref<1x!tpu.dma_semaphore, #tpu.memory_space<semaphore_mem>>
      %135 = tpu.memref_squeeze %134 : memref<1x!tpu.dma_semaphore, #tpu.memory_space<semaphore_mem>> -> memref<!tpu.dma_semaphore, #tpu.memory_space<semaphore_mem>>
      tpu.enqueue_dma source(%131 : memref<128xf32, #tpu.memory_space<any>>) target(%133 : memref<128xf32, #tpu.memory_space<vmem>>) target_semaphore(%135 : memref<!tpu.dma_semaphore, #tpu.memory_space<semaphore_mem>>)
      %c4_i32_64 = arith.constant 4 : i32
      %136 = arith.addi %99, %c4_i32_64 : i32
      %137 = arith.index_cast %136 : i32 to index
      %138 = memref.load %arg2[%137] : memref<16xi32, #tpu.memory_space<smem>>
      %c0_i32_65 = arith.constant 0 : i32
      %139 = tpu.memref_slice %arg3[%138, %c0_i32_65] : memref<50x128xf32, #tpu.memory_space<any>> -> memref<1x128xf32, #tpu.memory_space<any>>
      %140 = tpu.memref_squeeze %139 : memref<1x128xf32, #tpu.memory_space<any>> -> memref<128xf32, #tpu.memory_space<any>>
      %c0_i32_66 = arith.constant 0 : i32
      %141 = tpu.memref_slice %arg8[%98, %c4_i32_64, %c0_i32_66] : memref<2x8x128xf32, #tpu.memory_space<vmem>> -> memref<1x1x128xf32, #tpu.memory_space<vmem>>
      %142 = tpu.memref_squeeze %141 : memref<1x1x128xf32, #tpu.memory_space<vmem>> -> memref<128xf32, #tpu.memory_space<vmem>>
      %143 = tpu.memref_slice %arg9[%98] : memref<2x!tpu.dma_semaphore, #tpu.memory_space<semaphore_mem>> -> memref<1x!tpu.dma_semaphore, #tpu.memory_space<semaphore_mem>>
      %144 = tpu.memref_squeeze %143 : memref<1x!tpu.dma_semaphore, #tpu.memory_space<semaphore_mem>> -> memref<!tpu.dma_semaphore, #tpu.memory_space<semaphore_mem>>
      tpu.enqueue_dma source(%140 : memref<128xf32, #tpu.memory_space<any>>) target(%142 : memref<128xf32, #tpu.memory_space<vmem>>) target_semaphore(%144 : memref<!tpu.dma_semaphore, #tpu.memory_space<semaphore_mem>>)
      %c5_i32_67 = arith.constant 5 : i32
      %145 = arith.addi %99, %c5_i32_67 : i32
      %146 = arith.index_cast %145 : i32 to index
      %147 = memref.load %arg2[%146] : memref<16xi32, #tpu.memory_space<smem>>
      %c0_i32_68 = arith.constant 0 : i32
      %148 = tpu.memref_slice %arg3[%147, %c0_i32_68] : memref<50x128xf32, #tpu.memory_space<any>> -> memref<1x128xf32, #tpu.memory_space<any>>
      %149 = tpu.memref_squeeze %148 : memref<1x128xf32, #tpu.memory_space<any>> -> memref<128xf32, #tpu.memory_space<any>>
      %c0_i32_69 = arith.constant 0 : i32
      %150 = tpu.memref_slice %arg8[%98, %c5_i32_67, %c0_i32_69] : memref<2x8x128xf32, #tpu.memory_space<vmem>> -> memref<1x1x128xf32, #tpu.memory_space<vmem>>
      %151 = tpu.memref_squeeze %150 : memref<1x1x128xf32, #tpu.memory_space<vmem>> -> memref<128xf32, #tpu.memory_space<vmem>>
      %152 = tpu.memref_slice %arg9[%98] : memref<2x!tpu.dma_semaphore, #tpu.memory_space<semaphore_mem>> -> memref<1x!tpu.dma_semaphore, #tpu.memory_space<semaphore_mem>>
      %153 = tpu.memref_squeeze %152 : memref<1x!tpu.dma_semaphore, #tpu.memory_space<semaphore_mem>> -> memref<!tpu.dma_semaphore, #tpu.memory_space<semaphore_mem>>
      tpu.enqueue_dma source(%149 : memref<128xf32, #tpu.memory_space<any>>) target(%151 : memref<128xf32, #tpu.memory_space<vmem>>) target_semaphore(%153 : memref<!tpu.dma_semaphore, #tpu.memory_space<semaphore_mem>>)
      %c6_i32_70 = arith.constant 6 : i32
      %154 = arith.addi %99, %c6_i32_70 : i32
      %155 = arith.index_cast %154 : i32 to index
      %156 = memref.load %arg2[%155] : memref<16xi32, #tpu.memory_space<smem>>
      %c0_i32_71 = arith.constant 0 : i32
      %157 = tpu.memref_slice %arg3[%156, %c0_i32_71] : memref<50x128xf32, #tpu.memory_space<any>> -> memref<1x128xf32, #tpu.memory_space<any>>
      %158 = tpu.memref_squeeze %157 : memref<1x128xf32, #tpu.memory_space<any>> -> memref<128xf32, #tpu.memory_space<any>>
      %c0_i32_72 = arith.constant 0 : i32
      %159 = tpu.memref_slice %arg8[%98, %c6_i32_70, %c0_i32_72] : memref<2x8x128xf32, #tpu.memory_space<vmem>> -> memref<1x1x128xf32, #tpu.memory_space<vmem>>
      %160 = tpu.memref_squeeze %159 : memref<1x1x128xf32, #tpu.memory_space<vmem>> -> memref<128xf32, #tpu.memory_space<vmem>>
      %161 = tpu.memref_slice %arg9[%98] : memref<2x!tpu.dma_semaphore, #tpu.memory_space<semaphore_mem>> -> memref<1x!tpu.dma_semaphore, #tpu.memory_space<semaphore_mem>>
      %162 = tpu.memref_squeeze %161 : memref<1x!tpu.dma_semaphore, #tpu.memory_space<semaphore_mem>> -> memref<!tpu.dma_semaphore, #tpu.memory_space<semaphore_mem>>
      tpu.enqueue_dma source(%158 : memref<128xf32, #tpu.memory_space<any>>) target(%160 : memref<128xf32, #tpu.memory_space<vmem>>) target_semaphore(%162 : memref<!tpu.dma_semaphore, #tpu.memory_space<semaphore_mem>>)
      %c7_i32_73 = arith.constant 7 : i32
      %163 = arith.addi %99, %c7_i32_73 : i32
      %164 = arith.index_cast %163 : i32 to index
      %165 = memref.load %arg2[%164] : memref<16xi32, #tpu.memory_space<smem>>
      %c0_i32_74 = arith.constant 0 : i32
      %166 = tpu.memref_slice %arg3[%165, %c0_i32_74] : memref<50x128xf32, #tpu.memory_space<any>> -> memref<1x128xf32, #tpu.memory_space<any>>
      %167 = tpu.memref_squeeze %166 : memref<1x128xf32, #tpu.memory_space<any>> -> memref<128xf32, #tpu.memory_space<any>>
      %c0_i32_75 = arith.constant 0 : i32
      %168 = tpu.memref_slice %arg8[%98, %c7_i32_73, %c0_i32_75] : memref<2x8x128xf32, #tpu.memory_space<vmem>> -> memref<1x1x128xf32, #tpu.memory_space<vmem>>
      %169 = tpu.memref_squeeze %168 : memref<1x1x128xf32, #tpu.memory_space<vmem>> -> memref<128xf32, #tpu.memory_space<vmem>>
      %170 = tpu.memref_slice %arg9[%98] : memref<2x!tpu.dma_semaphore, #tpu.memory_space<semaphore_mem>> -> memref<1x!tpu.dma_semaphore, #tpu.memory_space<semaphore_mem>>
      %171 = tpu.memref_squeeze %170 : memref<1x!tpu.dma_semaphore, #tpu.memory_space<semaphore_mem>> -> memref<!tpu.dma_semaphore, #tpu.memory_space<semaphore_mem>>
      tpu.enqueue_dma source(%167 : memref<128xf32, #tpu.memory_space<any>>) target(%169 : memref<128xf32, #tpu.memory_space<vmem>>) target_semaphore(%171 : memref<!tpu.dma_semaphore, #tpu.memory_space<semaphore_mem>>)
      %c8_i32_76 = arith.constant 8 : i32
    } else {
    }
    %c0_i32_9 = arith.constant 0 : i32
    %c0_i32_10 = arith.constant 0 : i32
    %c0_i32_11 = arith.constant 0 : i32
    %19 = tpu.memref_slice %arg3[%c0_i32_10, %c0_i32_11] : memref<50x128xf32, #tpu.memory_space<any>> -> memref<1x128xf32, #tpu.memory_space<any>>
    %20 = tpu.memref_squeeze %19 : memref<1x128xf32, #tpu.memory_space<any>> -> memref<128xf32, #tpu.memory_space<any>>
    %c0_i32_12 = arith.constant 0 : i32
    %21 = tpu.memref_slice %arg8[%11, %c0_i32_9, %c0_i32_12] : memref<2x8x128xf32, #tpu.memory_space<vmem>> -> memref<1x1x128xf32, #tpu.memory_space<vmem>>
    %22 = tpu.memref_squeeze %21 : memref<1x1x128xf32, #tpu.memory_space<vmem>> -> memref<128xf32, #tpu.memory_space<vmem>>
    %23 = tpu.memref_slice %arg9[%11] : memref<2x!tpu.dma_semaphore, #tpu.memory_space<semaphore_mem>> -> memref<1x!tpu.dma_semaphore, #tpu.memory_space<semaphore_mem>>
    %24 = tpu.memref_squeeze %23 : memref<1x!tpu.dma_semaphore, #tpu.memory_space<semaphore_mem>> -> memref<!tpu.dma_semaphore, #tpu.memory_space<semaphore_mem>>
    tpu.wait_dma2 semaphore(%24 : memref<!tpu.dma_semaphore, #tpu.memory_space<semaphore_mem>>) src(%20 : memref<128xf32, #tpu.memory_space<any>>) dst(%22 : memref<128xf32, #tpu.memory_space<vmem>>)
    %c1_i32_13 = arith.constant 1 : i32
    %c0_i32_14 = arith.constant 0 : i32
    %c0_i32_15 = arith.constant 0 : i32
    %25 = tpu.memref_slice %arg3[%c0_i32_14, %c0_i32_15] : memref<50x128xf32, #tpu.memory_space<any>> -> memref<1x128xf32, #tpu.memory_space<any>>
    %26 = tpu.memref_squeeze %25 : memref<1x128xf32, #tpu.memory_space<any>> -> memref<128xf32, #tpu.memory_space<any>>
    %c0_i32_16 = arith.constant 0 : i32
    %27 = tpu.memref_slice %arg8[%11, %c1_i32_13, %c0_i32_16] : memref<2x8x128xf32, #tpu.memory_space<vmem>> -> memref<1x1x128xf32, #tpu.memory_space<vmem>>
    %28 = tpu.memref_squeeze %27 : memref<1x1x128xf32, #tpu.memory_space<vmem>> -> memref<128xf32, #tpu.memory_space<vmem>>
    %29 = tpu.memref_slice %arg9[%11] : memref<2x!tpu.dma_semaphore, #tpu.memory_space<semaphore_mem>> -> memref<1x!tpu.dma_semaphore, #tpu.memory_space<semaphore_mem>>
    %30 = tpu.memref_squeeze %29 : memref<1x!tpu.dma_semaphore, #tpu.memory_space<semaphore_mem>> -> memref<!tpu.dma_semaphore, #tpu.memory_space<semaphore_mem>>
    tpu.wait_dma2 semaphore(%30 : memref<!tpu.dma_semaphore, #tpu.memory_space<semaphore_mem>>) src(%26 : memref<128xf32, #tpu.memory_space<any>>) dst(%28 : memref<128xf32, #tpu.memory_space<vmem>>)
    %c2_i32_17 = arith.constant 2 : i32
    %c0_i32_18 = arith.constant 0 : i32
    %c0_i32_19 = arith.constant 0 : i32
    %31 = tpu.memref_slice %arg3[%c0_i32_18, %c0_i32_19] : memref<50x128xf32, #tpu.memory_space<any>> -> memref<1x128xf32, #tpu.memory_space<any>>
    %32 = tpu.memref_squeeze %31 : memref<1x128xf32, #tpu.memory_space<any>> -> memref<128xf32, #tpu.memory_space<any>>
    %c0_i32_20 = arith.constant 0 : i32
    %33 = tpu.memref_slice %arg8[%11, %c2_i32_17, %c0_i32_20] : memref<2x8x128xf32, #tpu.memory_space<vmem>> -> memref<1x1x128xf32, #tpu.memory_space<vmem>>
    %34 = tpu.memref_squeeze %33 : memref<1x1x128xf32, #tpu.memory_space<vmem>> -> memref<128xf32, #tpu.memory_space<vmem>>
    %35 = tpu.memref_slice %arg9[%11] : memref<2x!tpu.dma_semaphore, #tpu.memory_space<semaphore_mem>> -> memref<1x!tpu.dma_semaphore, #tpu.memory_space<semaphore_mem>>
    %36 = tpu.memref_squeeze %35 : memref<1x!tpu.dma_semaphore, #tpu.memory_space<semaphore_mem>> -> memref<!tpu.dma_semaphore, #tpu.memory_space<semaphore_mem>>
    tpu.wait_dma2 semaphore(%36 : memref<!tpu.dma_semaphore, #tpu.memory_space<semaphore_mem>>) src(%32 : memref<128xf32, #tpu.memory_space<any>>) dst(%34 : memref<128xf32, #tpu.memory_space<vmem>>)
    %c3_i32 = arith.constant 3 : i32
    %c0_i32_21 = arith.constant 0 : i32
    %c0_i32_22 = arith.constant 0 : i32
    %37 = tpu.memref_slice %arg3[%c0_i32_21, %c0_i32_22] : memref<50x128xf32, #tpu.memory_space<any>> -> memref<1x128xf32, #tpu.memory_space<any>>
    %38 = tpu.memref_squeeze %37 : memref<1x128xf32, #tpu.memory_space<any>> -> memref<128xf32, #tpu.memory_space<any>>
    %c0_i32_23 = arith.constant 0 : i32
    %39 = tpu.memref_slice %arg8[%11, %c3_i32, %c0_i32_23] : memref<2x8x128xf32, #tpu.memory_space<vmem>> -> memref<1x1x128xf32, #tpu.memory_space<vmem>>
    %40 = tpu.memref_squeeze %39 : memref<1x1x128xf32, #tpu.memory_space<vmem>> -> memref<128xf32, #tpu.memory_space<vmem>>
    %41 = tpu.memref_slice %arg9[%11] : memref<2x!tpu.dma_semaphore, #tpu.memory_space<semaphore_mem>> -> memref<1x!tpu.dma_semaphore, #tpu.memory_space<semaphore_mem>>
    %42 = tpu.memref_squeeze %41 : memref<1x!tpu.dma_semaphore, #tpu.memory_space<semaphore_mem>> -> memref<!tpu.dma_semaphore, #tpu.memory_space<semaphore_mem>>
    tpu.wait_dma2 semaphore(%42 : memref<!tpu.dma_semaphore, #tpu.memory_space<semaphore_mem>>) src(%38 : memref<128xf32, #tpu.memory_space<any>>) dst(%40 : memref<128xf32, #tpu.memory_space<vmem>>)
    %c4_i32 = arith.constant 4 : i32
    %c0_i32_24 = arith.constant 0 : i32
    %c0_i32_25 = arith.constant 0 : i32
    %43 = tpu.memref_slice %arg3[%c0_i32_24, %c0_i32_25] : memref<50x128xf32, #tpu.memory_space<any>> -> memref<1x128xf32, #tpu.memory_space<any>>
    %44 = tpu.memref_squeeze %43 : memref<1x128xf32, #tpu.memory_space<any>> -> memref<128xf32, #tpu.memory_space<any>>
    %c0_i32_26 = arith.constant 0 : i32
    %45 = tpu.memref_slice %arg8[%11, %c4_i32, %c0_i32_26] : memref<2x8x128xf32, #tpu.memory_space<vmem>> -> memref<1x1x128xf32, #tpu.memory_space<vmem>>
    %46 = tpu.memref_squeeze %45 : memref<1x1x128xf32, #tpu.memory_space<vmem>> -> memref<128xf32, #tpu.memory_space<vmem>>
    %47 = tpu.memref_slice %arg9[%11] : memref<2x!tpu.dma_semaphore, #tpu.memory_space<semaphore_mem>> -> memref<1x!tpu.dma_semaphore, #tpu.memory_space<semaphore_mem>>
    %48 = tpu.memref_squeeze %47 : memref<1x!tpu.dma_semaphore, #tpu.memory_space<semaphore_mem>> -> memref<!tpu.dma_semaphore, #tpu.memory_space<semaphore_mem>>
    tpu.wait_dma2 semaphore(%48 : memref<!tpu.dma_semaphore, #tpu.memory_space<semaphore_mem>>) src(%44 : memref<128xf32, #tpu.memory_space<any>>) dst(%46 : memref<128xf32, #tpu.memory_space<vmem>>)
    %c5_i32 = arith.constant 5 : i32
    %c0_i32_27 = arith.constant 0 : i32
    %c0_i32_28 = arith.constant 0 : i32
    %49 = tpu.memref_slice %arg3[%c0_i32_27, %c0_i32_28] : memref<50x128xf32, #tpu.memory_space<any>> -> memref<1x128xf32, #tpu.memory_space<any>>
    %50 = tpu.memref_squeeze %49 : memref<1x128xf32, #tpu.memory_space<any>> -> memref<128xf32, #tpu.memory_space<any>>
    %c0_i32_29 = arith.constant 0 : i32
    %51 = tpu.memref_slice %arg8[%11, %c5_i32, %c0_i32_29] : memref<2x8x128xf32, #tpu.memory_space<vmem>> -> memref<1x1x128xf32, #tpu.memory_space<vmem>>
    %52 = tpu.memref_squeeze %51 : memref<1x1x128xf32, #tpu.memory_space<vmem>> -> memref<128xf32, #tpu.memory_space<vmem>>
    %53 = tpu.memref_slice %arg9[%11] : memref<2x!tpu.dma_semaphore, #tpu.memory_space<semaphore_mem>> -> memref<1x!tpu.dma_semaphore, #tpu.memory_space<semaphore_mem>>
    %54 = tpu.memref_squeeze %53 : memref<1x!tpu.dma_semaphore, #tpu.memory_space<semaphore_mem>> -> memref<!tpu.dma_semaphore, #tpu.memory_space<semaphore_mem>>
    tpu.wait_dma2 semaphore(%54 : memref<!tpu.dma_semaphore, #tpu.memory_space<semaphore_mem>>) src(%50 : memref<128xf32, #tpu.memory_space<any>>) dst(%52 : memref<128xf32, #tpu.memory_space<vmem>>)
    %c6_i32 = arith.constant 6 : i32
    %c0_i32_30 = arith.constant 0 : i32
    %c0_i32_31 = arith.constant 0 : i32
    %55 = tpu.memref_slice %arg3[%c0_i32_30, %c0_i32_31] : memref<50x128xf32, #tpu.memory_space<any>> -> memref<1x128xf32, #tpu.memory_space<any>>
    %56 = tpu.memref_squeeze %55 : memref<1x128xf32, #tpu.memory_space<any>> -> memref<128xf32, #tpu.memory_space<any>>
    %c0_i32_32 = arith.constant 0 : i32
    %57 = tpu.memref_slice %arg8[%11, %c6_i32, %c0_i32_32] : memref<2x8x128xf32, #tpu.memory_space<vmem>> -> memref<1x1x128xf32, #tpu.memory_space<vmem>>
    %58 = tpu.memref_squeeze %57 : memref<1x1x128xf32, #tpu.memory_space<vmem>> -> memref<128xf32, #tpu.memory_space<vmem>>
    %59 = tpu.memref_slice %arg9[%11] : memref<2x!tpu.dma_semaphore, #tpu.memory_space<semaphore_mem>> -> memref<1x!tpu.dma_semaphore, #tpu.memory_space<semaphore_mem>>
    %60 = tpu.memref_squeeze %59 : memref<1x!tpu.dma_semaphore, #tpu.memory_space<semaphore_mem>> -> memref<!tpu.dma_semaphore, #tpu.memory_space<semaphore_mem>>
    tpu.wait_dma2 semaphore(%60 : memref<!tpu.dma_semaphore, #tpu.memory_space<semaphore_mem>>) src(%56 : memref<128xf32, #tpu.memory_space<any>>) dst(%58 : memref<128xf32, #tpu.memory_space<vmem>>)
    %c7_i32 = arith.constant 7 : i32
    %c0_i32_33 = arith.constant 0 : i32
    %c0_i32_34 = arith.constant 0 : i32
    %61 = tpu.memref_slice %arg3[%c0_i32_33, %c0_i32_34] : memref<50x128xf32, #tpu.memory_space<any>> -> memref<1x128xf32, #tpu.memory_space<any>>
    %62 = tpu.memref_squeeze %61 : memref<1x128xf32, #tpu.memory_space<any>> -> memref<128xf32, #tpu.memory_space<any>>
    %c0_i32_35 = arith.constant 0 : i32
    %63 = tpu.memref_slice %arg8[%11, %c7_i32, %c0_i32_35] : memref<2x8x128xf32, #tpu.memory_space<vmem>> -> memref<1x1x128xf32, #tpu.memory_space<vmem>>
    %64 = tpu.memref_squeeze %63 : memref<1x1x128xf32, #tpu.memory_space<vmem>> -> memref<128xf32, #tpu.memory_space<vmem>>
    %65 = tpu.memref_slice %arg9[%11] : memref<2x!tpu.dma_semaphore, #tpu.memory_space<semaphore_mem>> -> memref<1x!tpu.dma_semaphore, #tpu.memory_space<semaphore_mem>>
    %66 = tpu.memref_squeeze %65 : memref<1x!tpu.dma_semaphore, #tpu.memory_space<semaphore_mem>> -> memref<!tpu.dma_semaphore, #tpu.memory_space<semaphore_mem>>
    tpu.wait_dma2 semaphore(%66 : memref<!tpu.dma_semaphore, #tpu.memory_space<semaphore_mem>>) src(%62 : memref<128xf32, #tpu.memory_space<any>>) dst(%64 : memref<128xf32, #tpu.memory_space<vmem>>)
    %c8_i32 = arith.constant 8 : i32
    %67 = arith.index_cast %11 : i32 to index
    %c0 = arith.constant 0 : index
    %c0_36 = arith.constant 0 : index
    %68 = vector.load %arg8[%67, %c0, %c0_36] : memref<2x8x128xf32, #tpu.memory_space<vmem>>, vector<1x8x128xf32>
    %69 = vector.shape_cast %68 : vector<1x8x128xf32> to vector<8x128xf32>
    %c0_37 = arith.constant 0 : index
    %c0_38 = arith.constant 0 : index
    %70 = vector.load %arg4[%c0_37, %c0_38] : memref<8x128xf32, #tpu.memory_space<vmem>>, vector<8x128xf32>
    %71 = arith.addf %69, %70 : vector<8x128xf32>
    %cst = arith.constant dense<0.000000e+00> : vector<8xf32>
    %72 = vector.multi_reduction <add>, %71, %cst [1] : vector<8x128xf32> to vector<8xf32>
    %73 = vector.shape_cast %72 : vector<8xf32> to vector<8x1xf32>
    %cst_39 = arith.constant 3.125000e-02 : f32
    %74 = vector.broadcast %cst_39 : f32 to vector<8x1xf32>
    %75 = arith.mulf %73, %74 : vector<8x1xf32>
    %76 = arith.mulf %71, %71 : vector<8x128xf32>
    %cst_40 = arith.constant dense<0.000000e+00> : vector<8xf32>
    %77 = vector.multi_reduction <add>, %76, %cst_40 [1] : vector<8x128xf32> to vector<8xf32>
    %78 = vector.shape_cast %77 : vector<8xf32> to vector<8x1xf32>
    %cst_41 = arith.constant 3.125000e-02 : f32
    %79 = vector.broadcast %cst_41 : f32 to vector<8x1xf32>
    %80 = arith.mulf %78, %79 : vector<8x1xf32>
    %81 = arith.mulf %75, %75 : vector<8x1xf32>
    %82 = arith.subf %80, %81 : vector<8x1xf32>
    %83 = vector.broadcast %75 : vector<8x1xf32> to vector<8x128xf32>
    %84 = arith.subf %71, %83 : vector<8x128xf32>
    %cst_42 = arith.constant 9.99999974E-6 : f32
    %85 = vector.broadcast %cst_42 : f32 to vector<8x1xf32>
    %86 = arith.addf %82, %85 : vector<8x1xf32>
    %87 = math.rsqrt %86 : vector<8x1xf32>
    %88 = vector.broadcast %87 : vector<8x1xf32> to vector<8x128xf32>
    %89 = arith.mulf %84, %88 : vector<8x128xf32>
    %c0_43 = arith.constant 0 : index
    %c0_44 = arith.constant 0 : index
    %90 = vector.load %arg5[%c0_43, %c0_44] : memref<1x128xf32, #tpu.memory_space<vmem>>, vector<1x128xf32>
    %91 = vector.broadcast %90 : vector<1x128xf32> to vector<8x128xf32>
    %92 = arith.mulf %89, %91 : vector<8x128xf32>
    %c0_45 = arith.constant 0 : index
    %c0_46 = arith.constant 0 : index
    %93 = vector.load %arg6[%c0_45, %c0_46] : memref<1x128xf32, #tpu.memory_space<vmem>>, vector<1x128xf32>
    %94 = vector.broadcast %93 : vector<1x128xf32> to vector<8x128xf32>
    %95 = arith.addf %92, %94 : vector<8x128xf32>
    %c0_47 = arith.constant 0 : index
    %c0_48 = arith.constant 0 : index
    %96 = vector.load %arg7[%c0_47, %c0_48] : memref<8x128xf32, #tpu.memory_space<vmem>>, vector<8x128xf32>
    tpu.vector_store %arg7[%c0_47, %c0_48], %95 {strides = array<i32>} : memref<8x128xf32, #tpu.memory_space<vmem>>, vector<8x128xf32>,
    return
  }
  func.func @transform_1(%arg0: i32, %arg1: i32, %arg2: memref<16xi32, #tpu.memory_space<smem>>) -> (i32, i32) {
    %c2_i32 = arith.constant 2 : i32
    %0 = arith.muli %arg0, %c2_i32 : i32
    %1 = arith.addi %0, %arg1 : i32
    %c0_i32 = arith.constant 0 : i32
    %c0_i32_0 = arith.constant 0 : i32
    %c0_i32_1 = arith.constant 0 : i32
    return %c0_i32, %c0_i32_0 : i32, i32
  }
  func.func @transform_2(%arg0: i32, %arg1: i32, %arg2: memref<16xi32, #tpu.memory_space<smem>>) -> (i32, i32) {
    %c0_i32 = arith.constant 0 : i32
    %c0_i32_0 = arith.constant 0 : i32
    %c0_i32_1 = arith.constant 0 : i32
    return %c0_i32, %c0_i32_0 : i32, i32
  }
  func.func @transform_3(%arg0: i32, %arg1: i32, %arg2: memref<16xi32, #tpu.memory_space<smem>>) -> (i32, i32) {
    %c0_i32 = arith.constant 0 : i32
    %c0_i32_0 = arith.constant 0 : i32
    %c0_i32_1 = arith.constant 0 : i32
    return %c0_i32, %c0_i32_0 : i32, i32
  }
  func.func @transform_4(%arg0: i32, %arg1: i32, %arg2: memref<16xi32, #tpu.memory_space<smem>>) -> (i32, i32) {
    %c2_i32 = arith.constant 2 : i32
    %0 = arith.muli %arg0, %c2_i32 : i32
    %1 = arith.addi %0, %arg1 : i32
    %c0_i32 = arith.constant 0 : i32
    %c0_i32_0 = arith.constant 0 : i32
    return %1, %c0_i32 : i32, i32
  }
}

</mosaic_0001>

<bundles_post_ra>
// kernel: tpu_custom_call.1
= control target key start
LH: loop header
LB: loop body
LE: loop exit
PB: predicated region body
PF: predicated region fallthrough
CT: control target
= control target key end

     0   :  { %s1469_s21 = smov [#allocation5]   ;;  %s2133_s0 = inlined_call_operand.hbm [shape: s32[16], index: 0, kind: input, shape index: {}]   ;;  %s2134_s1 = inlined_call_operand.hbm [shape: f32[50,128], index: 1, kind: input, shape index: {}]   ;;  %s2135_s2 = inlined_call_operand.hbm [shape: f32[16,128], index: 2, kind: input, shape index: {}]   ;;  %s2136_s3 = inlined_call_operand.vmem [shape: f32[1,128], index: 3, kind: input, shape index: {}]   ;;  %s2137_s4 = inlined_call_operand.vmem [shape: f32[1,128], index: 4, kind: input, shape index: {}]   ;;  %s2138_s5 = inlined_call_operand.hbm [shape: f32[16,128], index: 5, kind: output, shape index: {}]  }
   0x1   :  { %2155 = sst [smem:[#allocation74_spill]] %s2135_s2  ;;  %s11_s20 = sshll.u32 %s2133_s0, 4  ;;  %s12_s20 = int_to_ptr.hbm [resolvable:$true] %s11_s20 }
   0x2   :  { %2156 = sst [smem:[#allocation75_spill]] %s2137_s4 }
   0x3   :  { %14 = dma.hbm_to_smem %s12_s20, 16, %s1469_s21, [#allocation4] }
   0x4   :  { %1433 = dma.done.wait [#allocation4], 16 }
   0x5   :  { %1434 = vsyncadd [#allocation4], 4294967280 }
   0x6   :  { %17 = sfence }
   0x7   :  { %18 = vsyncpa [#allocation7], 0 }
   0x8   :  { %19 = vsyncpa [#allocation8], 0 }
   0x9   :  { %21 = vsyncpa [#allocation8 + $0x1], 0  ;;  %s1505_s22 = smov 0   ;;  %s1507_s23 = smov 0  }
   0xa   :  { %s1509_s24 = smov 0   ;;  %s1511_s25 = smov 0  }
   0xb   :  { %s1513_s26 = smov 0   ;;  %s1515_s0 = smov 0  }
   0xc LB: > { %2157 = sst [smem:[#allocation64_spill]] %s1447_s22  ;;  %s729_s27 = sadd.s32 4294967295, %s1467_s0   ;;  %s1467_s0 = sphi %s1515_s0, %s27_s0   ;;  %s1463_s26 = sphi %s1513_s26, %s2192_s26   ;;  %s1459_s25 = sphi %s1511_s25, %s2191_s25   ;;  %s1455_s24 = sphi %s1509_s24, %s2190_s24   ;;  %s1451_s23 = sphi %s1507_s23, %s2194_s23   ;;  %s1447_s22 = sphi %s1505_s22, %s2193_s22  }
   0xd   : > { %2158 = sst [smem:[#allocation65_spill]] %s1455_s24  ;;  %s730_s28 = sadd.s32 4294967294, %s1467_s0  }
   0xe   : > { %2159 = sst [smem:[#allocation66_spill]] %s1463_s26  ;;  %s36_s29 = sadd.s32 1, %s1463_s26 }
   0xf   : > { %2160 = sst [smem:[#allocation67_spill]] %s1467_s0  ;;  %s113_s30 = sadd.s32 1, %s1455_s24 }
  0x10   : > { %p37_p0 = scmp.ge.s32.totalorder %s36_s29, 2  ;;  %p123_p1 = scmp.ne.s32.totalorder %s1455_s24, %s1451_s23 }
  0x11   : > { %p124_p2 = scmp.eq.s32.totalorder %s729_s27, 1  ;;  %p129_p3 = scmp.ne.s32.totalorder %s1451_s23, %s1447_s22 }
  0x12   : > { %s2196_s29 = smov (%p37_p0, %s36_s29), 0  ;;  %p130_p5 = scmp.eq.s32.totalorder %s730_s28, 1 }
  0x13   : > { %2161 = sst [smem:[#allocation68_spill]] %s2196_s29  ;;  %p1545_p4 = por %p124_p2, %p123_p1 }
  0x14   : > { %s110_s7 = ssub.s32 %s1463_s26, %s2196_s29  ;;  %p731_p6 = scmp.ge.s32.totalorder %s1467_s0, 1 }
  0x15   : > { %s2162_s6 = scalar_select %p1545_p4, 1, 0 }
  0x16   : > { %p111_p7 = scmp.eq.s32.totalorder %s110_s7, 0  ;;  %p1552_p8 = por %p130_p5, %p129_p3 }
  0x17   : > { %2163 = sst [smem:[#allocation69_spill]] %s2162_s6  ;;  %p137_p9 = scmp.lt.s32.totalorder %s1467_s0, 3 }
  0x18   : > { %s2164_s8 = scalar_select %p1552_p8, 1, 0 }
  0x19   : > { %s1558_s9 = scalar_select %p111_p7, %s1455_s24, %s113_s30  }
  0x1a   : > { %2165 = sst [smem:[#allocation70_spill]] %s2164_s8  ;;  %p138_p10 = pnand %p731_p6, %p137_p9 }
  0x1b   : > { %2166 = sst [smem:[#allocation71_spill]] %s1558_s9  ;;  %p832_p11 = scmp.eq.s32.totalorder %s729_s27, 0 }
  0x1c   : > { %s2167_s2 = sld [smem:[#allocation74_spill]]  ;;  %p824_p12 = pneg %p138_p10 }
  0x1d   : > { %s1470_s13 = smov [#allocation6]  }
  0x1e   : > { %s151_s14 = sshll.u32 %s1470_s13, 4  ;;  %p825_p13 = pnand %p832_p11, %p824_p12  ;;  %s152_s14 = int_to_ptr.vmem [resolvable:$true] %s151_s14 }
  0x1f   : > { %170 = sbr.rel (%p138_p10) target bundleno = 670 (0x29e), region = 32 }
  0x22   : > { %s149_s12 = sshll.u32 %s2167_s2, 4  ;;  %s150_s12 = int_to_ptr.hbm [resolvable:$true] %s149_s12 }
  0x23   : > { %827 = dma.hbm_to_vmem [thread:$0]  (!%p825_p13), %s150_s12, 128, %s152_s14, [#allocation7]  }
  0x24   : > { %1436 = dma.done.wait (%p832_p11), [#allocation7], 128  }
  0x25   : > { %1438 = vsyncadd (%p832_p11), [#allocation7], 4294967168  ;;  %s2139_s15 = sand.u32 1, %s1451_s23   ;;  %p194_p0 = scmp.lt.s32.totalorder %s1459_s25, 0 }
  0x26   : > { %s1567_s16 = sshll.u32 %s2139_s15, 3  ;;  %s195_s17 = ssub.s32 0, %s1459_s25 }
  0x27   : > { %s736_s18 = smin.u32 %s1459_s25, %s195_s17  ;;  %p834_p1 = scmp.eq.s32.totalorder %s1459_s25, 0 }
  0x28   : > { %s197_s19 = sand.u32 1, %s736_s18   ;;  %s1573_s21 = sshll.u32 %s1459_s25, 3 }
  0x29   : > { %s198_s20 = ssub.s32 0, %s197_s19  ;;  %s229_s12 = sadd.s32 1, %s1573_s21 }
  0x2a   : > { %s2198_s20 = smov (!%p194_p0, %s198_s20), %s197_s19  ;;  %s2202_s12 = smov (!%p834_p1, %s229_s12), 0 }
  0x2b   : > { %p738_p2 = scmp.lt.s32.totalorder %s2198_s20, 0  ;;  %s204_s27 = sadd.s32 2, %s2198_s20 }
  0x2c   : > { %s773_s28 = scalar_select %p834_p1, [#allocation5], [#allocation44] }
  0x2d   : > { %s2200_s27 = smov (!%p738_p2, %s204_s27), %s2198_s20  ;;  %s247_s10 = sadd.s32 2, %s1573_s21 }
  0x2e   : > { %s774_s30 = scalar_select %p834_p1, %s1573_s21, 0 }
  0x2f   : > { %s741_s7 = sshll.u32 %s2200_s27, 3  ;;  %s1608_s29 = scalar_lea.sflag [#allocation3], %s2200_s27 }
  0x30   : > { %s211_s11 = sld [smem:[%s773_s28 + %s774_s30]]  ;;  %s1585_s13 = scalar_lea.vmem [#allocation2], %s741_s7 }
  0x31   : > { %s225_s14 = sshll.u32 %s1585_s13, 4  ;;  %s627_s17 = scalar_lea.vmem %s1585_s13, 1 [#allocation2]  ;;  %s1593_s14 = int_to_ptr.vmem [resolvable:$true] %s225_s14 }
  0x32   : > { %s776_s18 = scalar_select %p834_p1, [#allocation5], [#allocation45] }
  0x33   : > { %s1595_s19 = sshll.u32 %s627_s17, 4  ;;  %s244_s19 = int_to_ptr.vmem [resolvable:$true] %s1595_s19 }
  0x34   : > { %s1600_s30 = sld [smem:[%s776_s18 + %s2202_s12]]  ;;  %s1617_s12 = scalar_lea.hbm %s2134_s1, 56 }
  0x36   : > { %s212_s28 = scalar_lea.hbm %s2134_s1, %s211_s11 }
  0x37   : > { %s1602_s7 = sshll.u32 %s212_s28, 4  ;;  %s224_s7 = int_to_ptr.hbm [resolvable:$true] %s1602_s7 }
  0x38   : > { %s933_s26 = sshra.s32 %s224_s7, 4  ;;  %s934_s26 = int_to_ptr.hbm [resolvable:$true] %s933_s26 }
  0x39   : > { %s935_s17 = scalar_lea.hbm %s934_s26, 1  ;;  %p940_p7 = scmp.lt.s32.totalorder %s934_s26, %s2134_s1 }
  0x3a   : > { %p936_p3 = scmp.ne.s32.totalorder %s934_s26, %s935_s17  ;;  %p941_p9 = scmp.lt.s32.totalorder %s1617_s12, %s935_s17 }
  0x3c   : > { %p937_p5 = pnand %p936_p3, %p834_p1  ;;  %p942_p10 = por %p941_p9, %p940_p7 }
  0x3e   : > { %p938_p6 = pneg %p937_p5 }
  0x40   : > { %p943_p11 = pnand %p942_p10, %p938_p6 }
  0x42   : > { %946 = shalt.err (!%p943_p11)  }
  0x43   : > { %s947_s28 = sshra.s32 %s1593_s14, 4  ;;  %s1471_s15 = smov [#allocation2]   ;;  %s948_s28 = int_to_ptr.vmem [resolvable:$true] %s947_s28 }
  0x44   : > { %s949_s2 = scalar_lea.vmem %s948_s28, 1  ;;  %s1626_s11 = scalar_lea.vmem %s1471_s15, 16 }
  0x45   : > { %p950_p12 = scmp.ne.s32.totalorder %s948_s28, %s949_s2  ;;  %p954_p2 = scmp.lt.s32.totalorder %s948_s28, [#allocation2] }
  0x46   : > { %p955_p3 = scmp.lt.s32.totalorder %s1626_s11, %s949_s2 }
  0x47   : > { %p951_p13 = pnand %p950_p12, %p834_p1 }
  0x48   : > { %p956_p5 = por %p955_p3, %p954_p2 }
  0x49   : > { %p952_p0 = pneg %p951_p13 }
  0x4b   : > { %p957_p8 = pnand %p956_p5, %p952_p0 }
  0x4d   : > { %960 = shalt.err (!%p957_p8)  }
  0x4e   : > { %775 = dma.hbm_to_vmem [thread:$0]  (%p834_p1), %s224_s7, 16, %s1593_s14, %s1608_s29 }
  0x4f   : > { %s779_s2 = scalar_select %p834_p1, [#allocation5], [#allocation46] }
  0x50   : > { %s2204_s10 = smov (!%p834_p1, %s247_s10), 0  ;;  %s231_s18 = scalar_lea.hbm %s2134_s1, %s1600_s30 }
  0x51   : > { %s241_s20 = sshll.u32 %s231_s18, 4  ;;  %s1646_s28 = sld [smem:[%s779_s2 + %s2204_s10]]  ;;  %s242_s20 = int_to_ptr.hbm [resolvable:$true] %s241_s20 }
  0x52   : > { %s2168_s15 = scalar_lea.vmem %s1585_s13, 2 [#allocation2]  ;;  %s961_s24 = sshra.s32 %s242_s20, 4  ;;  %s962_s24 = int_to_ptr.hbm [resolvable:$true] %s961_s24 }
  0x53   : > { %s1650_s9 = sshll.u32 %s2168_s15, 4  ;;  %s963_s14 = scalar_lea.hbm %s962_s24, 1  ;;  %s262_s9 = int_to_ptr.vmem [resolvable:$true] %s1650_s9 }
  0x54   : > { %p964_p8 = scmp.ne.s32.totalorder %s962_s24, %s963_s14  ;;  %p968_p9 = scmp.lt.s32.totalorder %s962_s24, %s2134_s1 }
  0x55   : > { %p969_p10 = scmp.lt.s32.totalorder %s1617_s12, %s963_s14 }
  0x56   : > { %p965_p6 = pnand %p964_p8, %p834_p1 }
  0x57   : > { %p970_p11 = por %p969_p10, %p968_p9 }
  0x58   : > { %p966_p7 = pneg %p965_p6 }
  0x5a   : > { %p971_p12 = pnand %p970_p11, %p966_p7 }
  0x5c   : > { %974 = shalt.err (!%p971_p12)  }
  0x5d   : > { %s975_s10 = sshra.s32 %s244_s19, 4  ;;  %s976_s10 = int_to_ptr.vmem [resolvable:$true] %s975_s10 }
  0x5e   : > { %s977_s30 = scalar_lea.vmem %s976_s10, 1  ;;  %p982_p3 = scmp.lt.s32.totalorder %s976_s10, [#allocation2] }
  0x5f   : > { %p978_p13 = scmp.ne.s32.totalorder %s976_s10, %s977_s30  ;;  %p983_p5 = scmp.lt.s32.totalorder %s1626_s11, %s977_s30 }
  0x61   : > { %p979_p0 = pnand %p978_p13, %p834_p1  ;;  %p984_p8 = por %p983_p5, %p982_p3 }
  0x63   : > { %p980_p2 = pneg %p979_p0 }
  0x65   : > { %p985_p6 = pnand %p984_p8, %p980_p2 }
  0x67   : > { %988 = shalt.err (!%p985_p6)  }
  0x68   : > { %778 = dma.hbm_to_vmem [thread:$0]  (%p834_p1), %s242_s20, 16, %s244_s19, %s1608_s29 }
  0x69   : > { %s265_s24 = sadd.s32 3, %s1573_s21  ;;  %s635_s8 = scalar_lea.vmem %s1585_s13, 3 [#allocation2] }
  0x6a   : > { %s782_s2 = scalar_select %p834_p1, [#allocation5], [#allocation47] }
  0x6b   : > { %s2206_s24 = smov (!%p834_p1, %s265_s24), 0  ;;  %s249_s18 = scalar_lea.hbm %s2134_s1, %s1646_s28 }
  0x6c   : > { %s259_s15 = sshll.u32 %s249_s18, 4  ;;  %s1675_s14 = sld [smem:[%s782_s2 + %s2206_s24]]  ;;  %s260_s15 = int_to_ptr.hbm [resolvable:$true] %s259_s15 }
  0x6d   : > { %s1677_s7 = sshll.u32 %s635_s8, 4  ;;  %s989_s10 = sshra.s32 %s260_s15, 4  ;;  %s990_s10 = int_to_ptr.hbm [resolvable:$true] %s989_s10  ;;  %s280_s7 = int_to_ptr.vmem [resolvable:$true] %s1677_s7 }
  0x6e   : > { %s991_s19 = scalar_lea.hbm %s990_s10, 1  ;;  %p996_p11 = scmp.lt.s32.totalorder %s990_s10, %s2134_s1 }
  0x6f   : > { %p992_p7 = scmp.ne.s32.totalorder %s990_s10, %s991_s19  ;;  %p997_p12 = scmp.lt.s32.totalorder %s1617_s12, %s991_s19 }
  0x71   : > { %p993_p9 = pnand %p992_p7, %p834_p1  ;;  %p998_p13 = por %p997_p12, %p996_p11 }
  0x73   : > { %p994_p10 = pneg %p993_p9 }
  0x75   : > { %p999_p0 = pnand %p998_p13, %p994_p10 }
  0x77   : > { %1002 = shalt.err (!%p999_p0)  }
  0x78   : > { %s1003_s28 = sshra.s32 %s262_s9, 4  ;;  %s1004_s28 = int_to_ptr.vmem [resolvable:$true] %s1003_s28 }
  0x79   : > { %s1005_s24 = scalar_lea.vmem %s1004_s28, 1  ;;  %p1010_p8 = scmp.lt.s32.totalorder %s1004_s28, [#allocation2] }
  0x7a   : > { %p1006_p2 = scmp.ne.s32.totalorder %s1004_s28, %s1005_s24  ;;  %p1011_p6 = scmp.lt.s32.totalorder %s1626_s11, %s1005_s24 }
  0x7c   : > { %p1007_p3 = pnand %p1006_p2, %p834_p1  ;;  %p1012_p7 = por %p1011_p6, %p1010_p8 }
  0x7e   : > { %p1008_p5 = pneg %p1007_p3 }
  0x80   : > { %p1013_p9 = pnand %p1012_p7, %p1008_p5 }
  0x82   : > { %1016 = shalt.err (!%p1013_p9)  }
  0x83   : > { %781 = dma.hbm_to_vmem [thread:$0]  (%p834_p1), %s260_s15, 16, %s262_s9, %s1608_s29 }
  0x84   : > { %s283_s8 = sadd.s32 4, %s1573_s21  ;;  %s639_s2 = scalar_lea.vmem %s1585_s13, 4 [#allocation2] }
  0x85   : > { %s785_s26 = scalar_select %p834_p1, [#allocation5], [#allocation48] }
  0x86   : > { %s2208_s8 = smov (!%p834_p1, %s283_s8), 0  ;;  %s267_s10 = scalar_lea.hbm %s2134_s1, %s1675_s14 }
  0x87   : > { %s277_s19 = sshll.u32 %s267_s10, 4  ;;  %s1702_s20 = sld [smem:[%s785_s26 + %s2208_s8]]  ;;  %s278_s19 = int_to_ptr.hbm [resolvable:$true] %s277_s19 }
  0x88   : > { %s1704_s30 = sshll.u32 %s639_s2, 4  ;;  %s1017_s28 = sshra.s32 %s278_s19, 4  ;;  %s1018_s28 = int_to_ptr.hbm [resolvable:$true] %s1017_s28  ;;  %s298_s30 = int_to_ptr.vmem [resolvable:$true] %s1704_s30 }
  0x89   : > { %s1019_s9 = scalar_lea.hbm %s1018_s28, 1  ;;  %p1024_p13 = scmp.lt.s32.totalorder %s1018_s28, %s2134_s1 }
  0x8a   : > { %p1020_p10 = scmp.ne.s32.totalorder %s1018_s28, %s1019_s9  ;;  %p1025_p0 = scmp.lt.s32.totalorder %s1617_s12, %s1019_s9 }
  0x8c   : > { %p1021_p11 = pnand %p1020_p10, %p834_p1  ;;  %p1026_p2 = por %p1025_p0, %p1024_p13 }
  0x8e   : > { %p1022_p12 = pneg %p1021_p11 }
  0x90   : > { %p1027_p3 = pnand %p1026_p2, %p1022_p12 }
  0x92   : > { %1030 = shalt.err (!%p1027_p3)  }
  0x93   : > { %s1031_s14 = sshra.s32 %s280_s7, 4  ;;  %s1032_s14 = int_to_ptr.vmem [resolvable:$true] %s1031_s14 }
  0x94   : > { %s1033_s8 = scalar_lea.vmem %s1032_s14, 1  ;;  %p1038_p7 = scmp.lt.s32.totalorder %s1032_s14, [#allocation2] }
  0x95   : > { %p1034_p5 = scmp.ne.s32.totalorder %s1032_s14, %s1033_s8  ;;  %p1039_p9 = scmp.lt.s32.totalorder %s1626_s11, %s1033_s8 }
  0x97   : > { %p1035_p8 = pnand %p1034_p5, %p834_p1  ;;  %p1040_p10 = por %p1039_p9, %p1038_p7 }
  0x99   : > { %p1036_p6 = pneg %p1035_p8 }
  0x9b   : > { %p1041_p11 = pnand %p1040_p10, %p1036_p6 }
  0x9d   : > { %1044 = shalt.err (!%p1041_p11)  }
  0x9e   : > { %784 = dma.hbm_to_vmem [thread:$0]  (%p834_p1), %s278_s19, 16, %s280_s7, %s1608_s29 }
  0x9f   : > { %s301_s2 = sadd.s32 5, %s1573_s21  ;;  %s643_s26 = scalar_lea.vmem %s1585_s13, 5 [#allocation2] }
  0xa0   : > { %s788_s17 = scalar_select %p834_p1, [#allocation5], [#allocation49] }
  0xa1   : > { %s2210_s2 = smov (!%p834_p1, %s301_s2), 0  ;;  %s285_s28 = scalar_lea.hbm %s2134_s1, %s1702_s20 }
  0xa2   : > { %s295_s9 = sshll.u32 %s285_s28, 4  ;;  %s1729_s15 = sld [smem:[%s788_s17 + %s2210_s2]]  ;;  %s296_s9 = int_to_ptr.hbm [resolvable:$true] %s295_s9 }
  0xa3   : > { %s1731_s24 = sshll.u32 %s643_s26, 4  ;;  %s1045_s14 = sshra.s32 %s296_s9, 4  ;;  %s1046_s14 = int_to_ptr.hbm [resolvable:$true] %s1045_s14  ;;  %s316_s24 = int_to_ptr.vmem [resolvable:$true] %s1731_s24 }
  0xa4   : > { %s1047_s7 = scalar_lea.hbm %s1046_s14, 1  ;;  %p1052_p2 = scmp.lt.s32.totalorder %s1046_s14, %s2134_s1 }
  0xa5   : > { %p1048_p12 = scmp.ne.s32.totalorder %s1046_s14, %s1047_s7  ;;  %p1053_p3 = scmp.lt.s32.totalorder %s1617_s12, %s1047_s7 }
  0xa7   : > { %p1049_p13 = pnand %p1048_p12, %p834_p1  ;;  %p1054_p5 = por %p1053_p3, %p1052_p2 }
  0xa9   : > { %p1050_p0 = pneg %p1049_p13 }
  0xab   : > { %p1055_p8 = pnand %p1054_p5, %p1050_p0 }
  0xad   : > { %1058 = shalt.err (!%p1055_p8)  }
  0xae   : > { %s1059_s20 = sshra.s32 %s298_s30, 4  ;;  %s1060_s20 = int_to_ptr.vmem [resolvable:$true] %s1059_s20 }
  0xaf   : > { %s1061_s2 = scalar_lea.vmem %s1060_s20, 1  ;;  %p1066_p10 = scmp.lt.s32.totalorder %s1060_s20, [#allocation2] }
  0xb0   : > { %p1062_p6 = scmp.ne.s32.totalorder %s1060_s20, %s1061_s2  ;;  %p1067_p11 = scmp.lt.s32.totalorder %s1626_s11, %s1061_s2 }
  0xb2   : > { %p1063_p7 = pnand %p1062_p6, %p834_p1  ;;  %p1068_p12 = por %p1067_p11, %p1066_p10 }
  0xb4   : > { %p1064_p9 = pneg %p1063_p7 }
  0xb6   : > { %p1069_p13 = pnand %p1068_p12, %p1064_p9 }
  0xb8   : > { %1072 = shalt.err (!%p1069_p13)  }
  0xb9   : > { %787 = dma.hbm_to_vmem [thread:$0]  (%p834_p1), %s296_s9, 16, %s298_s30, %s1608_s29 }
  0xba   : > { %s319_s26 = sadd.s32 6, %s1573_s21  ;;  %s647_s17 = scalar_lea.vmem %s1585_s13, 6 [#allocation2] }
  0xbb   : > { %s791_s18 = scalar_select %p834_p1, [#allocation5], [#allocation50] }
  0xbc   : > { %s2212_s26 = smov (!%p834_p1, %s319_s26), 0  ;;  %s303_s14 = scalar_lea.hbm %s2134_s1, %s1729_s15 }
  0xbd   : > { %s313_s7 = sshll.u32 %s303_s14, 4  ;;  %s1756_s19 = sld [smem:[%s791_s18 + %s2212_s26]]  ;;  %s314_s7 = int_to_ptr.hbm [resolvable:$true] %s313_s7 }
  0xbe   : > { %s1758_s8 = sshll.u32 %s647_s17, 4  ;;  %s1073_s20 = sshra.s32 %s314_s7, 4  ;;  %s1074_s20 = int_to_ptr.hbm [resolvable:$true] %s1073_s20  ;;  %s334_s8 = int_to_ptr.vmem [resolvable:$true] %s1758_s8 }
  0xbf   : > { %s1075_s30 = scalar_lea.hbm %s1074_s20, 1  ;;  %p1080_p5 = scmp.lt.s32.totalorder %s1074_s20, %s2134_s1 }
  0xc0   : > { %p1076_p0 = scmp.ne.s32.totalorder %s1074_s20, %s1075_s30  ;;  %p1081_p8 = scmp.lt.s32.totalorder %s1617_s12, %s1075_s30 }
  0xc2   : > { %p1077_p2 = pnand %p1076_p0, %p834_p1  ;;  %p1082_p6 = por %p1081_p8, %p1080_p5 }
  0xc4   : > { %p1078_p3 = pneg %p1077_p2 }
  0xc6   : > { %p1083_p7 = pnand %p1082_p6, %p1078_p3 }
  0xc8   : > { %1086 = shalt.err (!%p1083_p7)  }
  0xc9   : > { %s1087_s15 = sshra.s32 %s316_s24, 4  ;;  %s1088_s15 = int_to_ptr.vmem [resolvable:$true] %s1087_s15 }
  0xca   : > { %s1089_s26 = scalar_lea.vmem %s1088_s15, 1  ;;  %p1094_p12 = scmp.lt.s32.totalorder %s1088_s15, [#allocation2] }
  0xcb   : > { %p1090_p9 = scmp.ne.s32.totalorder %s1088_s15, %s1089_s26  ;;  %p1095_p13 = scmp.lt.s32.totalorder %s1626_s11, %s1089_s26 }
  0xcd   : > { %p1091_p10 = pnand %p1090_p9, %p834_p1  ;;  %p1096_p0 = por %p1095_p13, %p1094_p12 }
  0xcf   : > { %p1092_p11 = pneg %p1091_p10 }
  0xd1   : > { %p1097_p2 = pnand %p1096_p0, %p1092_p11 }
  0xd3   : > { %1100 = shalt.err (!%p1097_p2)  }
  0xd4   : > { %790 = dma.hbm_to_vmem [thread:$0]  (%p834_p1), %s314_s7, 16, %s316_s24, %s1608_s29 }
  0xd5   : > { %s337_s17 = sadd.s32 7, %s1573_s21  ;;  %s651_s18 = scalar_lea.vmem %s1585_s13, 7 [#allocation2] }
  0xd6   : > { %s794_s10 = scalar_select %p834_p1, [#allocation5], [#allocation51] }
  0xd7   : > { %s2214_s17 = smov (!%p834_p1, %s337_s17), 0  ;;  %s321_s20 = scalar_lea.hbm %s2134_s1, %s1756_s19 }
  0xd8   : > { %s331_s30 = sshll.u32 %s321_s20, 4  ;;  %s1783_s9 = sld [smem:[%s794_s10 + %s2214_s17]]  ;;  %s332_s30 = int_to_ptr.hbm [resolvable:$true] %s331_s30 }
  0xd9   : > { %s1785_s2 = sshll.u32 %s651_s18, 4  ;;  %s1101_s15 = sshra.s32 %s332_s30, 4  ;;  %s1102_s15 = int_to_ptr.hbm [resolvable:$true] %s1101_s15  ;;  %s352_s2 = int_to_ptr.vmem [resolvable:$true] %s1785_s2 }
  0xda   : > { %s1103_s24 = scalar_lea.hbm %s1102_s15, 1  ;;  %p1108_p6 = scmp.lt.s32.totalorder %s1102_s15, %s2134_s1 }
  0xdb   : > { %p1104_p3 = scmp.ne.s32.totalorder %s1102_s15, %s1103_s24  ;;  %p1109_p7 = scmp.lt.s32.totalorder %s1617_s12, %s1103_s24 }
  0xdd   : > { %p1105_p5 = pnand %p1104_p3, %p834_p1  ;;  %p1110_p9 = por %p1109_p7, %p1108_p6 }
  0xdf   : > { %p1106_p8 = pneg %p1105_p5 }
  0xe1   : > { %p1111_p10 = pnand %p1110_p9, %p1106_p8 }
  0xe3   : > { %1114 = shalt.err (!%p1111_p10)  }
  0xe4   : > { %s1115_s19 = sshra.s32 %s334_s8, 4  ;;  %s1116_s19 = int_to_ptr.vmem [resolvable:$true] %s1115_s19 }
  0xe5   : > { %s1117_s17 = scalar_lea.vmem %s1116_s19, 1  ;;  %p1122_p0 = scmp.lt.s32.totalorder %s1116_s19, [#allocation2] }
  0xe6   : > { %p1118_p11 = scmp.ne.s32.totalorder %s1116_s19, %s1117_s17  ;;  %p1123_p2 = scmp.lt.s32.totalorder %s1626_s11, %s1117_s17 }
  0xe8   : > { %p1119_p12 = pnand %p1118_p11, %p834_p1  ;;  %p1124_p3 = por %p1123_p2, %p1122_p0 }
  0xea   : > { %p1120_p13 = pneg %p1119_p12 }
  0xec   : > { %p1125_p5 = pnand %p1124_p3, %p1120_p13 }
  0xee   : > { %1128 = shalt.err (!%p1125_p5)  }
  0xef   : > { %793 = dma.hbm_to_vmem [thread:$0]  (%p834_p1), %s332_s30, 16, %s334_s8, %s1608_s29 }
  0xf0   : > { %s2169_s18 = sadd.s32 1, %s1459_s25  ;;  %s2145_s28 = ssub.s32 1, %s2200_s27 }
  0xf1   : > { %p1801_p8 = scmp.lt.s32.totalorder %s2169_s18, 2  ;;  %s339_s24 = scalar_lea.hbm %s2134_s1, %s1783_s9 }
  0xf2   : > { %s1815_s7 = sshll.u32 %s2145_s28, 3  ;;  %s349_s26 = sshll.u32 %s339_s24, 4  ;;  %s350_s26 = int_to_ptr.hbm [resolvable:$true] %s349_s26 }
  0xf3   : > { %s798_s14 = scalar_select %p1801_p8, [#allocation5], [#allocation52] }
  0xf4   : > { %s1818_s8 = sadd.s32 8, %s1573_s21  ;;  %s1129_s30 = sshra.s32 %s350_s26, 4  ;;  %s1130_s30 = int_to_ptr.hbm [resolvable:$true] %s1129_s30 }
  0xf5   : > { %s1131_s19 = scalar_lea.hbm %s1130_s30, 1  ;;  %p1136_p10 = scmp.lt.s32.totalorder %s1130_s30, %s2134_s1 }
  0xf6   : > { %p1132_p6 = scmp.ne.s32.totalorder %s1130_s30, %s1131_s19  ;;  %p1137_p11 = scmp.lt.s32.totalorder %s1617_s12, %s1131_s19 }
  0xf8   : > { %p1133_p7 = pnand %p1132_p6, %p834_p1  ;;  %p1138_p12 = por %p1137_p11, %p1136_p10 }
  0xfa   : > { %p1134_p9 = pneg %p1133_p7 }
  0xfc   : > { %p1139_p13 = pnand %p1138_p12, %p1134_p9 }
  0xfe   : > { %1142 = shalt.err (!%p1139_p13)  }
  0xff   : > { %s1143_s9 = sshra.s32 %s352_s2, 4  ;;  %s1144_s9 = int_to_ptr.vmem [resolvable:$true] %s1143_s9 }
 0x100   : > { %s1145_s20 = scalar_lea.vmem %s1144_s9, 1  ;;  %p1150_p5 = scmp.lt.s32.totalorder %s1144_s9, [#allocation2] }
 0x101   : > { %p1146_p0 = scmp.ne.s32.totalorder %s1144_s9, %s1145_s20  ;;  %p1151_p6 = scmp.lt.s32.totalorder %s1626_s11, %s1145_s20 }
 0x103   : > { %p1147_p2 = pnand %p1146_p0, %p834_p1  ;;  %p1152_p7 = por %p1151_p6, %p1150_p5 }
 0x105   : > { %p1148_p3 = pneg %p1147_p2 }
 0x107   : > { %p1153_p4 = pnand %p1152_p7, %p1148_p3 }
 0x109   : > { %1156 = shalt.err (!%p1153_p4)  }
 0x10a   : > { %796 = dma.hbm_to_vmem [thread:$0]  (%p834_p1), %s350_s26, 16, %s352_s2, %s1608_s29 }
 0x10b   : > { %s799_s15 = scalar_select %p1801_p8, %s1818_s8, 0 }
 0x10c   : > { %s381_s24 = sadd.s32 1, %s1818_s8  ;;  %s1844_s25 = scalar_lea.vmem [#allocation2], %s1815_s7 }
 0x10d   : > { %s363_s30 = sld [smem:[%s798_s14 + %s799_s15]]  ;;  %s377_s19 = sshll.u32 %s1844_s25, 4  ;;  %s1856_s19 = int_to_ptr.vmem [resolvable:$true] %s377_s19 }
 0x10e   : > { %s801_s17 = scalar_select %p1801_p8, [#allocation5], [#allocation53] }
 0x10f   : > { %s2216_s24 = smov (!%p1801_p8, %s381_s24), 0  ;;  %s659_s18 = scalar_lea.vmem %s1844_s25, 1 [#allocation2] }
 0x110   : > { %s1852_s2 = sld [smem:[%s801_s17 + %s2216_s24]]  ;;  %s1854_s26 = sshll.u32 %s659_s18, 4 }
 0x111   : > { %2171 = sst [smem:[#allocation72_spill]] %s1854_s26  ;;  %s663_s14 = scalar_lea.vmem %s1844_s25, 2 [#allocation2] }
 0x112   : > { %s1867_s22 = sshll.u32 %s663_s14, 4  ;;  %s2172_s24 = ssub.s32 1, %s2200_s27  ;;  %s414_s22 = int_to_ptr.vmem [resolvable:$true] %s1867_s22 }
 0x113   : > { %s364_s20 = scalar_lea.hbm %s2134_s1, %s363_s30  ;;  %s1871_s17 = scalar_lea.sflag [#allocation3], %s2172_s24 }
 0x114   : > { %s1863_s28 = sshll.u32 %s364_s20, 4  ;;  %s376_s28 = int_to_ptr.hbm [resolvable:$true] %s1863_s28 }
 0x115   : > { %s1157_s18 = sshra.s32 %s376_s28, 4  ;;  %s1158_s18 = int_to_ptr.hbm [resolvable:$true] %s1157_s18 }
 0x116   : > { %s1159_s0 = scalar_lea.hbm %s1158_s18, 1  ;;  %p1164_p10 = scmp.lt.s32.totalorder %s1158_s18, %s2134_s1 }
 0x117   : > { %p1160_p4 = scmp.ne.s32.totalorder %s1158_s18, %s1159_s0  ;;  %p1165_p11 = scmp.lt.s32.totalorder %s1617_s12, %s1159_s0 }
 0x119   : > { %p1161_p1 = pnand %p1160_p4, %p1801_p8  ;;  %p1166_p12 = por %p1165_p11, %p1164_p10 }
 0x11b   : > { %p1162_p9 = pneg %p1161_p1 }
 0x11d   : > { %p1167_p13 = pnand %p1166_p12, %p1162_p9 }
 0x11f   : > { %1170 = shalt.err (!%p1167_p13)  }
 0x120   : > { %s1171_s27 = sshra.s32 %s1856_s19, 4  ;;  %s1172_s27 = int_to_ptr.vmem [resolvable:$true] %s1171_s27 }
 0x121   : > { %s1173_s14 = scalar_lea.vmem %s1172_s27, 1  ;;  %p1178_p5 = scmp.lt.s32.totalorder %s1172_s27, [#allocation2] }
 0x122   : > { %p1174_p0 = scmp.ne.s32.totalorder %s1172_s27, %s1173_s14  ;;  %p1179_p6 = scmp.lt.s32.totalorder %s1626_s11, %s1173_s14 }
 0x124   : > { %p1175_p2 = pnand %p1174_p0, %p1801_p8  ;;  %p1180_p7 = por %p1179_p6, %p1178_p5 }
 0x126   : > { %p1176_p3 = pneg %p1175_p2 }
 0x128   : > { %p1181_p4 = pnand %p1180_p7, %p1176_p3 }
 0x12a   : > { %1184 = shalt.err (!%p1181_p4)  }
 0x12b   : > { %800 = dma.hbm_to_vmem [thread:$0]  (%p1801_p8), %s376_s28, 16, %s1856_s19, %s1871_s17 }
 0x12c   : > { %s383_s20 = scalar_lea.hbm %s2134_s1, %s1852_s2  ;;  %s667_s24 = scalar_lea.vmem %s1844_s25, 3 [#allocation2] }
 0x12d   : > { %s393_s18 = sshll.u32 %s383_s20, 4  ;;  %s417_s7 = sadd.s32 3, %s1818_s8  ;;  %s394_s18 = int_to_ptr.hbm [resolvable:$true] %s393_s18 }
 0x12e   : > { %s1893_s30 = sshll.u32 %s667_s24, 4  ;;  %s1185_s27 = sshra.s32 %s394_s18, 4  ;;  %s1186_s27 = int_to_ptr.hbm [resolvable:$true] %s1185_s27 }
 0x12f   : > { %2173 = sst [smem:[#allocation73_spill]] %s1893_s30  ;;  %s1187_s14 = scalar_lea.hbm %s1186_s27, 1 }
 0x130   : > { %p1188_p1 = scmp.ne.s32.totalorder %s1186_s27, %s1187_s14  ;;  %p1192_p11 = scmp.lt.s32.totalorder %s1186_s27, %s2134_s1 }
 0x131   : > { %p1193_p12 = scmp.lt.s32.totalorder %s1617_s12, %s1187_s14 }
 0x132   : > { %p1189_p9 = pnand %p1188_p1, %p1801_p8 }
 0x133   : > { %p1194_p13 = por %p1193_p12, %p1192_p11 }
 0x134   : > { %p1190_p10 = pneg %p1189_p9 }
 0x136   : > { %p1195_p0 = pnand %p1194_p13, %p1190_p10 }
 0x138   : > { %1198 = shalt.err (!%p1195_p0)  }
 0x139   : > { %s2174_s28 = sld [smem:[#allocation72_spill]] }
 0x13f   : > { %s2175_s19 = int_to_ptr.vmem [resolvable:$true] %s2174_s28 }
 0x140   : > { %s1199_s2 = sshra.s32 %s2175_s19, 4  ;;  %s1200_s2 = int_to_ptr.vmem [resolvable:$true] %s1199_s2 }
 0x141   : > { %s1201_s0 = scalar_lea.vmem %s1200_s2, 1  ;;  %p1206_p6 = scmp.lt.s32.totalorder %s1200_s2, [#allocation2] }
 0x142   : > { %p1202_p2 = scmp.ne.s32.totalorder %s1200_s2, %s1201_s0  ;;  %p1207_p7 = scmp.lt.s32.totalorder %s1626_s11, %s1201_s0 }
 0x144   : > { %p1203_p3 = pnand %p1202_p2, %p1801_p8  ;;  %p1208_p4 = por %p1207_p7, %p1206_p6 }
 0x146   : > { %p1204_p5 = pneg %p1203_p3 }
 0x148   : > { %p1209_p1 = pnand %p1208_p4, %p1204_p5 }
 0x14a   : > { %1212 = shalt.err (!%p1209_p1)  }
 0x14b   : > { %s2176_s26 = smov %s2175_s19  ;;  %s2177_s9 = sadd.s32 2, %s1818_s8 }
 0x14c   : > { %803 = dma.hbm_to_vmem [thread:$0]  (%p1801_p8), %s394_s18, 16, %s2176_s26, %s1871_s17 }
 0x14d   : > { %s804_s15 = scalar_select %p1801_p8, [#allocation5], [#allocation54] }
 0x14e   : > { %s2218_s9 = smov (!%p1801_p8, %s2177_s9), 0  ;;  %s435_s27 = sadd.s32 4, %s1818_s8 }
 0x14f   : > { %s807_s20 = scalar_select %p1801_p8, [#allocation5], [#allocation55] }
 0x150   : > { %s400_s24 = sld [smem:[%s804_s15 + %s2218_s9]]  ;;  %s2220_s7 = smov (!%p1801_p8, %s417_s7), 0 }
 0x151   : > { %s810_s14 = scalar_select %p1801_p8, [#allocation5], [#allocation56] }
 0x152   : > { %s1926_s28 = sld [smem:[%s807_s20 + %s2220_s7]]  ;;  %s671_s19 = scalar_lea.vmem %s1844_s25, 4 [#allocation2] }
 0x153   : > { %s2222_s27 = smov (!%p1801_p8, %s435_s27), 0  ;;  %s1938_s9 = sshll.u32 %s671_s19, 4  ;;  %s450_s9 = int_to_ptr.vmem [resolvable:$true] %s1938_s9 }
 0x154   : > { %s1936_s26 = sld [smem:[%s810_s14 + %s2222_s27]]  ;;  %s453_s4 = sadd.s32 5, %s1818_s8 }
 0x156   : > { %s401_s0 = scalar_lea.hbm %s2134_s1, %s400_s24 }
 0x157   : > { %s411_s15 = sshll.u32 %s401_s0, 4  ;;  %s412_s15 = int_to_ptr.hbm [resolvable:$true] %s411_s15 }
 0x158   : > { %s1213_s6 = sshra.s32 %s412_s15, 4  ;;  %s1214_s6 = int_to_ptr.hbm [resolvable:$true] %s1213_s6 }
 0x159   : > { %s1215_s7 = scalar_lea.hbm %s1214_s6, 1  ;;  %p1220_p12 = scmp.lt.s32.totalorder %s1214_s6, %s2134_s1 }
 0x15a   : > { %p1216_p9 = scmp.ne.s32.totalorder %s1214_s6, %s1215_s7  ;;  %p1221_p13 = scmp.lt.s32.totalorder %s1617_s12, %s1215_s7 }
 0x15c   : > { %p1217_p10 = pnand %p1216_p9, %p1801_p8  ;;  %p1222_p0 = por %p1221_p13, %p1220_p12 }
 0x15e   : > { %p1218_p11 = pneg %p1217_p10 }
 0x160   : > { %p1223_p2 = pnand %p1222_p0, %p1218_p11 }
 0x162   : > { %1226 = shalt.err (!%p1223_p2)  }
 0x163   : > { %s1227_s24 = sshra.s32 %s414_s22, 4  ;;  %s1228_s24 = int_to_ptr.vmem [resolvable:$true] %s1227_s24 }
 0x164   : > { %s1229_s27 = scalar_lea.vmem %s1228_s24, 1  ;;  %p1234_p7 = scmp.lt.s32.totalorder %s1228_s24, [#allocation2] }
 0x165   : > { %p1230_p3 = scmp.ne.s32.totalorder %s1228_s24, %s1229_s27  ;;  %p1235_p4 = scmp.lt.s32.totalorder %s1626_s11, %s1229_s27 }
 0x167   : > { %p1231_p5 = pnand %p1230_p3, %p1801_p8  ;;  %p1236_p1 = por %p1235_p4, %p1234_p7 }
 0x169   : > { %p1232_p6 = pneg %p1231_p5 }
 0x16b   : > { %p1237_p9 = pnand %p1236_p1, %p1232_p6 }
 0x16d   : > { %1240 = shalt.err (!%p1237_p9)  }
 0x16e   : > { %806 = dma.hbm_to_vmem [thread:$0]  (%p1801_p8), %s412_s15, 16, %s414_s22, %s1871_s17 }
 0x16f   : > { %s419_s14 = scalar_lea.hbm %s2134_s1, %s1926_s28  ;;  %s675_s18 = scalar_lea.vmem %s1844_s25, 5 [#allocation2] }
 0x170   : > { %s429_s19 = sshll.u32 %s419_s14, 4  ;;  %s437_s7 = scalar_lea.hbm %s2134_s1, %s1936_s26  ;;  %s430_s19 = int_to_ptr.hbm [resolvable:$true] %s429_s19 }
 0x171   : > { %s1241_s20 = sshra.s32 %s430_s19, 4  ;;  %s1242_s20 = int_to_ptr.hbm [resolvable:$true] %s1241_s20 }
 0x172   : > { %s1243_s24 = scalar_lea.hbm %s1242_s20, 1  ;;  %p1248_p13 = scmp.lt.s32.totalorder %s1242_s20, %s2134_s1 }
 0x173   : > { %p1244_p10 = scmp.ne.s32.totalorder %s1242_s20, %s1243_s24  ;;  %p1249_p0 = scmp.lt.s32.totalorder %s1617_s12, %s1243_s24 }
 0x175   : > { %p1245_p11 = pnand %p1244_p10, %p1801_p8  ;;  %p1250_p2 = por %p1249_p0, %p1248_p13 }
 0x177   : > { %p1246_p12 = pneg %p1245_p11 }
 0x179   : > { %p1251_p3 = pnand %p1250_p2, %p1246_p12 }
 0x17b   : > { %1254 = shalt.err (!%p1251_p3)  }
 0x17c   : > { %s2178_s28 = sld [smem:[#allocation73_spill]] }
 0x182   : > { %s2179_s27 = int_to_ptr.vmem [resolvable:$true] %s2178_s28 }
 0x183   : > { %s1255_s26 = sshra.s32 %s2179_s27, 4  ;;  %s1256_s26 = int_to_ptr.vmem [resolvable:$true] %s1255_s26 }
 0x184   : > { %s1257_s6 = scalar_lea.vmem %s1256_s26, 1  ;;  %p1262_p4 = scmp.lt.s32.totalorder %s1256_s26, [#allocation2] }
 0x185   : > { %p1258_p5 = scmp.ne.s32.totalorder %s1256_s26, %s1257_s6  ;;  %p1263_p1 = scmp.lt.s32.totalorder %s1626_s11, %s1257_s6 }
 0x187   : > { %p1259_p6 = pnand %p1258_p5, %p1801_p8  ;;  %p1264_p9 = por %p1263_p1, %p1262_p4 }
 0x189   : > { %p1260_p7 = pneg %p1259_p6 }
 0x18b   : > { %p1265_p10 = pnand %p1264_p9, %p1260_p7 }
 0x18d   : > { %1268 = shalt.err (!%p1265_p10)  }
 0x18e   : > { %s2180_s30 = smov %s2179_s27  ;;  %s447_s14 = sshll.u32 %s437_s7, 4  ;;  %s448_s14 = int_to_ptr.hbm [resolvable:$true] %s447_s14 }
 0x18f   : > { %809 = dma.hbm_to_vmem [thread:$0]  (%p1801_p8), %s430_s19, 16, %s2180_s30, %s1871_s17 }
 0x190   : > { %s1983_s2 = sshll.u32 %s675_s18, 4  ;;  %s471_s0 = sadd.s32 6, %s1818_s8  ;;  %s468_s2 = int_to_ptr.vmem [resolvable:$true] %s1983_s2 }
 0x191   : > { %s1269_s20 = sshra.s32 %s448_s14, 4  ;;  %s1270_s20 = int_to_ptr.hbm [resolvable:$true] %s1269_s20 }
 0x192   : > { %s1271_s24 = scalar_lea.hbm %s1270_s20, 1  ;;  %p1276_p0 = scmp.lt.s32.totalorder %s1270_s20, %s2134_s1 }
 0x193   : > { %p1272_p11 = scmp.ne.s32.totalorder %s1270_s20, %s1271_s24  ;;  %p1277_p2 = scmp.lt.s32.totalorder %s1617_s12, %s1271_s24 }
 0x195   : > { %p1273_p12 = pnand %p1272_p11, %p1801_p8  ;;  %p1278_p3 = por %p1277_p2, %p1276_p0 }
 0x197   : > { %p1274_p13 = pneg %p1273_p12 }
 0x199   : > { %p1279_p5 = pnand %p1278_p3, %p1274_p13 }
 0x19b   : > { %1282 = shalt.err (!%p1279_p5)  }
 0x19c   : > { %s1283_s19 = sshra.s32 %s450_s9, 4  ;;  %s1284_s19 = int_to_ptr.vmem [resolvable:$true] %s1283_s19 }
 0x19d   : > { %s1285_s18 = scalar_lea.vmem %s1284_s19, 1  ;;  %p1290_p1 = scmp.lt.s32.totalorder %s1284_s19, [#allocation2] }
 0x19e   : > { %p1286_p6 = scmp.ne.s32.totalorder %s1284_s19, %s1285_s18  ;;  %p1291_p9 = scmp.lt.s32.totalorder %s1626_s11, %s1285_s18 }
 0x1a0   : > { %p1287_p7 = pnand %p1286_p6, %p1801_p8  ;;  %p1292_p10 = por %p1291_p9, %p1290_p1 }
 0x1a2   : > { %p1288_p4 = pneg %p1287_p7 }
 0x1a4   : > { %p1293_p11 = pnand %p1292_p10, %p1288_p4 }
 0x1a6   : > { %1296 = shalt.err (!%p1293_p11)  }
 0x1a7   : > { %812 = dma.hbm_to_vmem [thread:$0]  (%p1801_p8), %s448_s14, 16, %s450_s9, %s1871_s17 }
 0x1a8   : > { %s813_s7 = scalar_select %p1801_p8, [#allocation5], [#allocation57] }
 0x1a9   : > { %s2224_s4 = smov (!%p1801_p8, %s453_s4), 0  ;;  %s2226_s0 = smov (!%p1801_p8, %s471_s0), 0 }
 0x1aa   : > { %s816_s28 = scalar_select %p1801_p8, [#allocation5], [#allocation58] }
 0x1ab   : > { %s454_s27 = sld [smem:[%s813_s7 + %s2224_s4]]  ;;  %s489_s26 = sadd.s32 7, %s1818_s8 }
 0x1ac   : > { %s2014_s6 = sld [smem:[%s816_s28 + %s2226_s0]]  ;;  %s679_s30 = scalar_lea.vmem %s1844_s25, 6 [#allocation2] }
 0x1ad   : > { %s819_s9 = scalar_select %p1801_p8, [#allocation5], [#allocation59] }
 0x1ae   : > { %s2228_s26 = smov (!%p1801_p8, %s489_s26), 0  ;;  %s2024_s22 = sshll.u32 %s679_s30, 4  ;;  %s486_s22 = int_to_ptr.vmem [resolvable:$true] %s2024_s22 }
 0x1af   : > { %s2026_s15 = sld [smem:[%s819_s9 + %s2228_s26]]  ;;  %s683_s19 = scalar_lea.vmem %s1844_s25, 7 [#allocation2] }
 0x1b1   : > { %s455_s24 = scalar_lea.hbm %s2134_s1, %s454_s27 }
 0x1b2   : > { %s465_s4 = sshll.u32 %s455_s24, 4  ;;  %s466_s4 = int_to_ptr.hbm [resolvable:$true] %s465_s4 }
 0x1b3   : > { %s1297_s8 = sshra.s32 %s466_s4, 4  ;;  %s1298_s8 = int_to_ptr.hbm [resolvable:$true] %s1297_s8 }
 0x1b4   : > { %s1299_s0 = scalar_lea.hbm %s1298_s8, 1  ;;  %p1304_p2 = scmp.lt.s32.totalorder %s1298_s8, %s2134_s1 }
 0x1b5   : > { %p1300_p12 = scmp.ne.s32.totalorder %s1298_s8, %s1299_s0  ;;  %p1305_p3 = scmp.lt.s32.totalorder %s1617_s12, %s1299_s0 }
 0x1b7   : > { %p1301_p13 = pnand %p1300_p12, %p1801_p8  ;;  %p1306_p5 = por %p1305_p3, %p1304_p2 }
 0x1b9   : > { %p1302_p0 = pneg %p1301_p13 }
 0x1bb   : > { %p1307_p6 = pnand %p1306_p5, %p1302_p0 }
 0x1bd   : > { %1310 = shalt.err (!%p1307_p6)  }
 0x1be   : > { %s1311_s25 = sshra.s32 %s468_s2, 4  ;;  %s1312_s25 = int_to_ptr.vmem [resolvable:$true] %s1311_s25 }
 0x1bf   : > { %s1313_s28 = scalar_lea.vmem %s1312_s25, 1  ;;  %p1318_p9 = scmp.lt.s32.totalorder %s1312_s25, [#allocation2] }
 0x1c0   : > { %p1314_p7 = scmp.ne.s32.totalorder %s1312_s25, %s1313_s28  ;;  %p1319_p10 = scmp.lt.s32.totalorder %s1626_s11, %s1313_s28 }
 0x1c2   : > { %p1315_p4 = pnand %p1314_p7, %p1801_p8  ;;  %p1320_p11 = por %p1319_p10, %p1318_p9 }
 0x1c4   : > { %p1316_p1 = pneg %p1315_p4 }
 0x1c6   : > { %p1321_p12 = pnand %p1320_p11, %p1316_p1 }
 0x1c8   : > { %1324 = shalt.err (!%p1321_p12)  }
 0x1c9   : > { %815 = dma.hbm_to_vmem [thread:$0]  (%p1801_p8), %s466_s4, 16, %s468_s2, %s1871_s17 }
 0x1ca   : > { %s473_s30 = scalar_lea.hbm %s2134_s1, %s2014_s6  ;;  %s2050_s14 = sshll.u32 %s683_s19, 4  ;;  %s504_s14 = int_to_ptr.vmem [resolvable:$true] %s2050_s14 }
 0x1cb   : > { %s483_s9 = sshll.u32 %s473_s30, 4  ;;  %s484_s9 = int_to_ptr.hbm [resolvable:$true] %s483_s9 }
 0x1cc   : > { %s1325_s20 = sshra.s32 %s484_s9, 4  ;;  %s1326_s20 = int_to_ptr.hbm [resolvable:$true] %s1325_s20 }
 0x1cd   : > { %s1327_s24 = scalar_lea.hbm %s1326_s20, 1  ;;  %p1332_p3 = scmp.lt.s32.totalorder %s1326_s20, %s2134_s1 }
 0x1ce   : > { %p1328_p13 = scmp.ne.s32.totalorder %s1326_s20, %s1327_s24  ;;  %p1333_p5 = scmp.lt.s32.totalorder %s1617_s12, %s1327_s24 }
 0x1d0   : > { %p1329_p0 = pnand %p1328_p13, %p1801_p8  ;;  %p1334_p6 = por %p1333_p5, %p1332_p3 }
 0x1d2   : > { %p1330_p2 = pneg %p1329_p0 }
 0x1d4   : > { %p1335_p7 = pnand %p1334_p6, %p1330_p2 }
 0x1d6   : > { %1338 = shalt.err (!%p1335_p7)  }
 0x1d7   : > { %s1339_s2 = sshra.s32 %s486_s22, 4  ;;  %s1340_s2 = int_to_ptr.vmem [resolvable:$true] %s1339_s2 }
 0x1d8   : > { %s1341_s6 = scalar_lea.vmem %s1340_s2, 1  ;;  %p1346_p10 = scmp.lt.s32.totalorder %s1340_s2, [#allocation2] }
 0x1d9   : > { %p1342_p4 = scmp.ne.s32.totalorder %s1340_s2, %s1341_s6  ;;  %p1347_p11 = scmp.lt.s32.totalorder %s1626_s11, %s1341_s6 }
 0x1db   : > { %p1343_p1 = pnand %p1342_p4, %p1801_p8  ;;  %p1348_p12 = por %p1347_p11, %p1346_p10 }
 0x1dd   : > { %p1344_p9 = pneg %p1343_p1 }
 0x1df   : > { %p1349_p13 = pnand %p1348_p12, %p1344_p9 }
 0x1e1   : > { %1352 = shalt.err (!%p1349_p13)  }
 0x1e2   : > { %818 = dma.hbm_to_vmem [thread:$0]  (%p1801_p8), %s484_s9, 16, %s486_s22, %s1871_s17 }
 0x1e3   : > { %s491_s18 = scalar_lea.hbm %s2134_s1, %s2026_s15 }
 0x1e4   : > { %s501_s7 = sshll.u32 %s491_s18, 4  ;;  %s502_s7 = int_to_ptr.hbm [resolvable:$true] %s501_s7 }
 0x1e5   : > { %s1353_s25 = sshra.s32 %s502_s7, 4  ;;  %s1354_s25 = int_to_ptr.hbm [resolvable:$true] %s1353_s25 }
 0x1e6   : > { %s1355_s28 = scalar_lea.hbm %s1354_s25, 1  ;;  %p1360_p5 = scmp.lt.s32.totalorder %s1354_s25, %s2134_s1 }
 0x1e7   : > { %p1356_p0 = scmp.ne.s32.totalorder %s1354_s25, %s1355_s28  ;;  %p1361_p6 = scmp.lt.s32.totalorder %s1617_s12, %s1355_s28 }
 0x1e9   : > { %p1357_p2 = pnand %p1356_p0, %p1801_p8  ;;  %p1362_p7 = por %p1361_p6, %p1360_p5 }
 0x1eb   : > { %p1358_p3 = pneg %p1357_p2 }
 0x1ed   : > { %p1363_p4 = pnand %p1362_p7, %p1358_p3 }
 0x1ef   : > { %1366 = shalt.err (!%p1363_p4)  }
 0x1f0   : > { %s1367_s22 = sshra.s32 %s504_s14, 4  ;;  %s1368_s22 = int_to_ptr.vmem [resolvable:$true] %s1367_s22 }
 0x1f1   : > { %s1369_s15 = scalar_lea.vmem %s1368_s22, 1  ;;  %p1374_p11 = scmp.lt.s32.totalorder %s1368_s22, [#allocation2] }
 0x1f2   : > { %p1370_p1 = scmp.ne.s32.totalorder %s1368_s22, %s1369_s15  ;;  %p1375_p12 = scmp.lt.s32.totalorder %s1626_s11, %s1369_s15 }
 0x1f4   : > { %p1371_p9 = pnand %p1370_p1, %p1801_p8  ;;  %p1376_p13 = por %p1375_p12, %p1374_p11 }
 0x1f6   : > { %p1372_p10 = pneg %p1371_p9 }
 0x1f8   : > { %p1377_p0 = pnand %p1376_p13, %p1372_p10 }
 0x1fa   : > { %1380 = shalt.err (!%p1377_p0)  }
 0x1fb   : > { %821 = dma.hbm_to_vmem [thread:$0]  (%p1801_p8), %s502_s7, 16, %s504_s14, %s1871_s17 }
 0x1fc   : > { %s189_s12 = scalar_lea.vmem [#allocation9], %s1567_s16 }
 0x1fd   : > { %1439 = dma.done.wait %s1608_s29, 128 }
 0x1fe   : > { %1440 = vsyncadd %s1608_s29, 4294967168  ;;  %v526_v0 = vld [vmem:[%s1585_s13] sm:$0xff]  ;;  %v527_v1 = vld [vmem:[#allocation6] sm:$0xff]  ;;  %s575_s17 = scalar_lea.hbm %s2138_s5, %s1573_s21  ;;  %s2181_s30 = sld [smem:[#allocation69_spill]] }
 0x1ff   : > { %v528_v2 = vadd.f32 %v527_v1, %v526_v0  ;;  %v887_v18 = vld [vmem:[%s2136_s3] ss:$0 sm:$0xff]  ;;  %s2182_s20 = sld [smem:[#allocation75_spill]]  ;;  %s577_s24 = sshll.u32 %s189_s12, 4  ;;  %s578_s24 = int_to_ptr.vmem [resolvable:$true] %s577_s24 }
 0x200   : > { %s579_s8 = sshll.u32 %s575_s17, 4  ;;  %s2183_s0 = sand.u32 1, %s1451_s23   ;;  %s580_s8 = int_to_ptr.hbm [resolvable:$true] %s579_s8 }
 0x201   : > { %529 = vadd.xlane.f32.xlu0 %v528_v2  ;;  %v532_v3 = vmul.f32 %v528_v2, %v528_v2  ;;  %s563_s2 = scalar_lea.sflag [#allocation8], %s2183_s0  ;;  %s1395_s6 = sshra.s32 %s580_s8, 4  ;;  %s1396_s6 = int_to_ptr.hbm [resolvable:$true] %s1395_s6 }
 0x202   : > { %s1397_s21 = scalar_lea.hbm %s1396_s6, 8  ;;  %s1401_s18 = scalar_lea.hbm %s2138_s5, 16 }
 0x203   : > { %p1398_p8 = scmp.ne.s32.totalorder %s1396_s6, %s1397_s21  ;;  %p1402_p6 = scmp.lt.s32.totalorder %s1396_s6, %s2138_s5 }
 0x204   : > { %p2184_p2 = scmp.ne.s32.totalorder %s2181_s30, 0  ;;  %p1403_p7 = scmp.lt.s32.totalorder %s1401_s18, %s1397_s21 }
 0x205   : > { %v888_v21 = vld [vmem:[%s2182_s20] ss:$0 sm:$0xff] }
 0x206   : > { %p1399_p3 = pnand %p1398_p8, %p2184_p2  ;;  %p1404_p4 = por %p1403_p7, %p1402_p6 }
 0x208   : > { %p1400_p5 = pneg %p1399_p3 }
 0x209   : > { %533 = vadd.xlane.f32.xlu0 %v532_v3 }
 0x20a   : > { %p1405_p1 = pnand %p1404_p4, %p1400_p5 }
 0x274   : > { %v530_v4 = vpop.xlane.xlu0 %529 }
 0x275   : > { %v531_v5 = vmul.f32 0.03125, %v530_v4 }
 0x277   : > { %v536_v7 = vmul.f32 %v531_v5, %v531_v5  ;;  %v538_v17 = vsub.f32 %v528_v2, %v531_v5 }
 0x27c   : > { %v534_v6 = vpop.xlane.xlu0 %533 }
 0x27d   : > { %v535_v8 = vmul.f32 0.03125, %v534_v6 }
 0x27f   : > { %v537_v9 = vsub.f32 %v535_v8, %v536_v7 }
 0x281   : > { %v539_v10 = vadd.f32 1e-05, %v537_v9 }
 0x283   : > { %889 = vrsqrt.f32 %v539_v10  ;;  %vm546_vm1 = vweird.f32 %v539_v10 }
 0x289   : > { %v890_v11 = vpop.eup %889 }
 0x28a   : > { %v541_v12 = vmul.f32 %v890_v11, %v539_v10  ;;  %vm547_vm0 = vweird.f32 %v890_v11 }
 0x28b   : > { %vm548_vm2 = vmor %vm546_vm1, %vm547_vm0 }
 0x28c   : > { %v542_v13 = vmul.f32 %v890_v11, %v541_v12 }
 0x28e   : > { %v543_v14 = vmul.f32 0.5, %v542_v13 }
 0x290   : > { %v544_v15 = vsub.f32 1.5, %v543_v14 }
 0x292   : > { %v545_v16 = vmul.f32 %v890_v11, %v544_v15 }
 0x294   : > { %v549_v19 = vsel %vm548_vm2, %v890_v11, %v545_v16 }
 0x295   : > { %v550_v20 = vmul.f32 %v549_v19, %v538_v17 }
 0x297   : > { %v555_v22 = vmul.f32 %v887_v18, %v550_v20 }
 0x299   : > { %v560_v23 = vadd.f32 %v888_v21, %v555_v22 }
 0x29b   : > { %561 = vst [vmem:[%s189_s12] sm:$0xff] %v560_v23 }
 0x29c   : > { %1408 = shalt.err (!%p1405_p1)
}
 0x29d   : > { %822 = dma.vmem_to_hbm [thread:$0]  (%p2184_p2), %s578_s24, 128, %s580_s8, %s563_s2  }
 0x29e PF: > { %s2185_s16 = sld [smem:[#allocation67_spill]] }
 0x29f   : > { %s2186_s28 = sld [smem:[#allocation64_spill]] }
 0x2a0   : > { %s2187_s27 = sld [smem:[#allocation70_spill]] }
 0x2a4   : > { %p836_p9 = scmp.ge.s32.totalorder %s2185_s16, 2 }
 0x2a5   : > { %s591_s26 = sand.u32 1, %s2186_s28  }
 0x2a6   : > { %p2188_p10 = scmp.ne.s32.totalorder %s2187_s27, 0  ;;  %s592_s22 = scalar_lea.sflag [#allocation8], %s591_s26 }
 0x2a8   : > { %p829_p11 = pnand %p836_p9, %p2188_p10 }
 0x2aa   : > { %p830_p12 = pneg %p829_p11 }
 0x2ac   : > { %1442 = dma.done.wait (%p830_p12), %s592_s22, 128  }
 0x2ad   : > { %1444 = vsyncadd (%p830_p12), %s592_s22, 4294967168  ;;  %s27_s0 = sadd.s32 1, %s2185_s16   ;;  %s2189_s15 = sld [smem:[#allocation65_spill]] }
 0x2ae   : > { %p24_p13 = scmp.ge.s32.totalorder %s27_s0, 4   ;;  %s2190_s24 = sld [smem:[#allocation71_spill]] }
 0x2af   : > { %s2191_s25 = sld [smem:[#allocation66_spill]]  ;;  %s2193_s22 = smov %s1451_s23 }
 0x2b0   : > { %s2192_s26 = sld [smem:[#allocation68_spill]]  ;;  %26 = sbr.rel (!%p24_p13) target bundleno = 12 (0xc), region = 178 }
 0x2b3   : > { %s2194_s23 = smov %s2189_s15 }
 0x2b5   :  { %598 = vsyncpa [#allocation7], 1 }
 0x2b6   :  { %600 = vsyncpa [#allocation7 + $0x1], 1 }
 0x2b7   :  { %601 = vsyncpa [#allocation8], 1 }
 0x2b8   :  { %603 = vsyncpa [#allocation8 + $0x1], 1 }
 0x2b9   :  { %604 = vsyncmov [#allocation3] }
 0x2bc   :  { %s605_s12 = vpop.sfrf %604 }
 0x2bd   :  { %p764_p0 = scmp.ne.s32.totalorder %s605_s12, 0 }
 0x2bf   :  { %609 = shalt.err (%p764_p0)  }
 0x2c0   :  { %611 = vsyncmov [#allocation3 + $0x1] }
 0x2c3   :  { %s612_s29 = vpop.sfrf %611 }
 0x2c4   :  { %p765_p8 = scmp.ne.s32.totalorder %s612_s29, 0 }
 0x2c6   :  { %616 = shalt.err (%p765_p8)  }

</bundles_post_ra>
